<compile_context>
chip_gen: v7x
topology: tpu7x:2x2x1
jax: 0.10.0
libtpu: 0.0.40
codegen_flags: <defaults>
</compile_context>

<pallas_src>
import math
import numpy as np
import jax
import jax.numpy as jnp
from jax.experimental import pallas as pl
from jax.experimental.pallas import tpu as pltpu


VMEM_LIMIT = 48 * 1024 * 1024  # safe on v7x (64 MiB phys), > scoped default on v5e/v6e
PARAM_DTYPE = jnp.bfloat16     # bf16 MXU path
ACT_DTYPE = jnp.bfloat16


def _pick_tile(dim, target, align):
    """Largest tile <= target that divides dim and is a multiple of `align`,
    else the full dim (full-extent blocks are always legal)."""
    if dim <= target:
        return dim
    t = (target // align) * align
    while t >= align:
        if dim % t == 0:
            return t
        t -= align
    return dim


# ----------------------------- tiled linear --------------------------------

def _linear_kernel(has_bias, act):
    def kernel(*refs):
        if has_bias:
            x_ref, w_ref, b_ref, o_ref, acc_ref = refs
        else:
            x_ref, w_ref, o_ref, acc_ref = refs
        k = pl.program_id(2)

        @pl.when(k == 0)
        def _():
            acc_ref[...] = jnp.zeros_like(acc_ref)

        acc_ref[...] += jnp.dot(x_ref[...], w_ref[...],
                                preferred_element_type=jnp.float32)

        @pl.when(k == pl.num_programs(2) - 1)
        def _():
            y = acc_ref[...]
            if has_bias:
                y = y + b_ref[...].astype(jnp.float32)
            if act == "gelu":
                y = jax.nn.gelu(y, approximate=True)
            o_ref[...] = y.astype(o_ref.dtype)

    return kernel


def pallas_linear(x, w, b=None, act=None, out_dtype=None):
    """x: [..., K] @ w: [K, N] (+ b[N]) with optional fused GELU.  Tiled + pipelined."""
    orig_shape = x.shape
    K = orig_shape[-1]
    M = int(np.prod(orig_shape[:-1]))
    N = w.shape[1]
    out_dtype = out_dtype or x.dtype
    x2 = x.reshape(M, K)

    tm = _pick_tile(M, 256, 16)     # bf16 sublane packing
    tn = _pick_tile(N, 512, 256)    # 256-wide MXU friendly
    tk = _pick_tile(K, 512, 256)
    grid = (M // tm, N // tn, K // tk)

    in_specs = [
        pl.BlockSpec((tm, tk), lambda i, j, k: (i, k)),
        pl.BlockSpec((tk, tn), lambda i, j, k: (k, j)),
    ]
    args = [x2, w]
    if b is not None:
        in_specs.append(pl.BlockSpec((1, tn), lambda i, j, k: (0, j)))
        args.append(b.reshape(1, N))

    out = pl.pallas_call(
        _linear_kernel(b is not None, act),
        grid=grid,
        in_specs=in_specs,
        out_specs=pl.BlockSpec((tm, tn), lambda i, j, k: (i, j)),
        out_shape=jax.ShapeDtypeStruct((M, N), out_dtype),
        scratch_shapes=[pltpu.VMEM((tm, tn), jnp.float32)],
        compiler_params=pltpu.CompilerParams(
            dimension_semantics=("parallel", "parallel", "arbitrary"),
            vmem_limit_bytes=VMEM_LIMIT),
    )(*args)
    return out.reshape(*orig_shape[:-1], N)


# --------------------------- LayerNorm (+residual) --------------------------

def _layernorm_kernel(has_res):
    def kernel(*refs):
        if has_res:
            x_ref, r_ref, g_ref, b_ref, o_ref = refs
        else:
            x_ref, g_ref, b_ref, o_ref = refs
        x = x_ref[...].astype(jnp.float32)
        if has_res:
            x = x + r_ref[...].astype(jnp.float32)
        mu = jnp.mean(x, axis=-1, keepdims=True)
        var = jnp.mean((x - mu) ** 2, axis=-1, keepdims=True)
        y = (x - mu) * jax.lax.rsqrt(var + 1e-5)
        y = y * g_ref[...].astype(jnp.float32) + b_ref[...].astype(jnp.float32)
        o_ref[...] = y.astype(o_ref.dtype)
    return kernel


def pallas_layernorm(x, gamma, beta, residual=None):
    """LayerNorm over the last axis, with the residual add fused in-kernel."""
    orig_shape = x.shape
    D = orig_shape[-1]
    M = int(np.prod(orig_shape[:-1]))
    x2 = x.reshape(M, D)

    tm = _pick_tile(M, 512, 8)
    grid = (M // tm,)

    in_specs = [pl.BlockSpec((tm, D), lambda i: (i, 0))]
    args = [x2]
    if residual is not None:
        in_specs.append(pl.BlockSpec((tm, D), lambda i: (i, 0)))
        args.append(residual.reshape(M, D))
    in_specs += [pl.BlockSpec((1, D), lambda i: (0, 0)),
                 pl.BlockSpec((1, D), lambda i: (0, 0))]
    args += [gamma.reshape(1, D), beta.reshape(1, D)]

    out = pl.pallas_call(
        _layernorm_kernel(residual is not None),
        grid=grid,
        in_specs=in_specs,
        out_specs=pl.BlockSpec((tm, D), lambda i: (i, 0)),
        out_shape=jax.ShapeDtypeStruct((M, D), x.dtype),
        compiler_params=pltpu.CompilerParams(
            dimension_semantics=("parallel",),
            vmem_limit_bytes=VMEM_LIMIT),
    )(*args)
    return out.reshape(orig_shape)


# ----------------------- multi-head attention core --------------------------

def _mha_kernel(n_heads, head_dim, scale, causal):
    def kernel(q_ref, k_ref, v_ref, m_ref, o_ref):
        q = q_ref[0]                      # (Tq, D) bf16
        k = k_ref[0]                      # (Tk, D) bf16
        v = v_ref[0]                      # (Tk, D) bf16
        Tq = q.shape[0]
        Tk = k.shape[0]

        # key-padding additive bias (1, Tk) built in-kernel from the [B, Tk] mask
        bias = (1.0 - m_ref[0].astype(jnp.float32)) * jnp.float32(-1e9)
        if causal:
            row = jax.lax.broadcasted_iota(jnp.int32, (Tq, Tk), 0)
            col = jax.lax.broadcasted_iota(jnp.int32, (Tq, Tk), 1)
            bias = bias + jnp.where(col > row, jnp.float32(-1e9), jnp.float32(0.0))

        outs = []
        for h in range(n_heads):          # static unroll over heads, one batch per grid step
            lo = h * head_dim
            hi = lo + head_dim
            qh = q[:, lo:hi]
            kh = k[:, lo:hi]
            vh = v[:, lo:hi]
            s = jnp.dot(qh, kh.T, preferred_element_type=jnp.float32) * scale + bias
            s = s - jnp.max(s, axis=-1, keepdims=True)
            p = jnp.exp(s)
            p = p * pl.reciprocal(jnp.sum(p, axis=-1, keepdims=True), approx=True)
            outs.append(jnp.dot(p.astype(vh.dtype), vh,
                                preferred_element_type=jnp.float32))
        # single lane-dense store of all heads
        o_ref[0] = jnp.concatenate(outs, axis=-1).astype(o_ref.dtype)
    return kernel


def pallas_mha(q, k, v, kv_mask, n_heads, causal):
    """q: [B,Tq,D], k/v: [B,Tk,D], kv_mask: [B,Tk] (1=keep, 0=pad). Returns [B,Tq,D]."""
    B, Tq, D = q.shape
    Tk = k.shape[1]
    Dh = D // n_heads
    scale = 1.0 / math.sqrt(Dh)
    m3 = kv_mask.astype(jnp.float32).reshape(B, 1, Tk)

    return pl.pallas_call(
        _mha_kernel(n_heads, Dh, scale, causal),
        grid=(B,),
        in_specs=[
            pl.BlockSpec((1, Tq, D), lambda b: (b, 0, 0)),
            pl.BlockSpec((1, Tk, D), lambda b: (b, 0, 0)),
            pl.BlockSpec((1, Tk, D), lambda b: (b, 0, 0)),
            pl.BlockSpec((1, 1, Tk), lambda b: (b, 0, 0)),
        ],
        out_specs=pl.BlockSpec((1, Tq, D), lambda b: (b, 0, 0)),
        out_shape=jax.ShapeDtypeStruct((B, Tq, D), q.dtype),
        compiler_params=pltpu.CompilerParams(
            dimension_semantics=("parallel",),
            vmem_limit_bytes=VMEM_LIMIT),
    )(q, k, v, m3)


# ----------------------------- model pieces ---------------------------------

def self_attention(x, kv_mask, causal, p, prefix, n_heads):
    D = x.shape[-1]
    qkv = pallas_linear(x, p[f"{prefix}_qkv_w"], p[f"{prefix}_qkv_b"])   # fused QKV
    q = qkv[..., :D]
    k = qkv[..., D:2 * D]
    v = qkv[..., 2 * D:]
    o = pallas_mha(q, k, v, kv_mask, n_heads, causal)
    return pallas_linear(o, p[f"{prefix}_o_w"], p[f"{prefix}_o_b"])


def cross_attention(x_q, x_kv, kv_mask, p, prefix, n_heads):
    D = x_q.shape[-1]
    q = pallas_linear(x_q, p[f"{prefix}_q_w"], p[f"{prefix}_q_b"])
    kv = pallas_linear(x_kv, p[f"{prefix}_kv_w"], p[f"{prefix}_kv_b"])   # fused KV
    k = kv[..., :D]
    v = kv[..., D:]
    o = pallas_mha(q, k, v, kv_mask, n_heads, causal=False)
    return pallas_linear(o, p[f"{prefix}_o_w"], p[f"{prefix}_o_b"])


def ffn_block(x, p, prefix):
    h = pallas_linear(x, p[f"{prefix}_fc1_w"], p[f"{prefix}_fc1_b"], act="gelu")
    return pallas_linear(h, p[f"{prefix}_fc2_w"], p[f"{prefix}_fc2_b"])


def embed(ids, tok_emb, pos_emb, ln_g, ln_b):
    B, T = ids.shape
    x = jnp.take(tok_emb, ids, axis=0) + pos_emb[None, :T, :]   # gather + pos: plain-JAX glue
    return pallas_layernorm(x, ln_g, ln_b)


def encoder_layer(x, enc_kv_mask, p, li, n_heads):
    pre = f"enc{li}"
    a = self_attention(x, enc_kv_mask, False, p, pre + "_sa", n_heads)
    x = pallas_layernorm(a, p[pre + "_ln1_g"], p[pre + "_ln1_b"], residual=x)
    f = ffn_block(x, p, pre)
    x = pallas_layernorm(f, p[pre + "_ln2_g"], p[pre + "_ln2_b"], residual=x)
    return x


def decoder_layer(x, dec_kv_mask, enc_out, enc_kv_mask, p, li, n_heads):
    pre = f"dec{li}"
    a = self_attention(x, dec_kv_mask, True, p, pre + "_sa", n_heads)
    x = pallas_layernorm(a, p[pre + "_ln1_g"], p[pre + "_ln1_b"], residual=x)
    c = cross_attention(x, enc_out, enc_kv_mask, p, pre + "_ca", n_heads)
    x = pallas_layernorm(c, p[pre + "_ln2_g"], p[pre + "_ln2_b"], residual=x)
    f = ffn_block(x, p, pre)
    x = pallas_layernorm(f, p[pre + "_ln3_g"], p[pre + "_ln3_b"], residual=x)
    return x


def bart_seq2seq_forward(p, cfg, input_ids, attention_mask,
                         decoder_input_ids, decoder_attention_mask):
    enc_kv_mask = attention_mask.astype(jnp.float32)            # [B, Ts]
    dec_kv_mask = decoder_attention_mask.astype(jnp.float32)    # [B, Tt]

    # encoder
    x = embed(input_ids, p["src_tok_emb"], p["src_pos_emb"],
              p["src_emb_ln_g"], p["src_emb_ln_b"])
    for li in range(cfg["n_enc_layers"]):
        x = encoder_layer(x, enc_kv_mask, p, li, cfg["n_heads"])
    enc_out = x

    # decoder (causal self-attn + cross-attn over encoder keys)
    y = embed(decoder_input_ids, p["tgt_tok_emb"], p["tgt_pos_emb"],
              p["tgt_emb_ln_g"], p["tgt_emb_ln_b"])
    for li in range(cfg["n_dec_layers"]):
        y = decoder_layer(y, dec_kv_mask, enc_out, enc_kv_mask, p, li, cfg["n_heads"])

    # output projection (no bias), logits over tgt vocab in f32
    return pallas_linear(y, p["out_w"], None, out_dtype=jnp.float32)


# ------------------------------ param init ----------------------------------

def init_params(key, cfg):
    d = cfg["d_model"]
    ffn = cfg["ffn_dim"]
    std = cfg["init_std"]
    pad = cfg["pad_idx"]
    keys = list(jax.random.split(key, 512))
    ki = iter(range(len(keys)))

    def nrm(shape):
        return (jax.random.normal(keys[next(ki)], shape, jnp.float32) * std).astype(PARAM_DTYPE)

    p = {}
    p["src_tok_emb"] = nrm((cfg["src_vocab"], d)).at[pad].set(0.0)
    p["tgt_tok_emb"] = nrm((cfg["tgt_vocab"], d)).at[pad].set(0.0)
    p["src_pos_emb"] = nrm((cfg["max_pos"], d))
    p["tgt_pos_emb"] = nrm((cfg["max_pos"], d))
    for pre in ("src_emb", "tgt_emb"):
        p[pre + "_ln_g"] = jnp.ones((d,), jnp.float32)
        p[pre + "_ln_b"] = jnp.zeros((d,), jnp.float32)

    def self_attn_params(pre):
        p[f"{pre}_qkv_w"] = nrm((d, 3 * d))
        p[f"{pre}_qkv_b"] = jnp.zeros((3 * d,), PARAM_DTYPE)
        p[f"{pre}_o_w"] = nrm((d, d))
        p[f"{pre}_o_b"] = jnp.zeros((d,), PARAM_DTYPE)

    def cross_attn_params(pre):
        p[f"{pre}_q_w"] = nrm((d, d))
        p[f"{pre}_q_b"] = jnp.zeros((d,), PARAM_DTYPE)
        p[f"{pre}_kv_w"] = nrm((d, 2 * d))
        p[f"{pre}_kv_b"] = jnp.zeros((2 * d,), PARAM_DTYPE)
        p[f"{pre}_o_w"] = nrm((d, d))
        p[f"{pre}_o_b"] = jnp.zeros((d,), PARAM_DTYPE)

    def ffn_params(pre):
        p[f"{pre}_fc1_w"] = nrm((d, ffn))
        p[f"{pre}_fc1_b"] = jnp.zeros((ffn,), PARAM_DTYPE)
        p[f"{pre}_fc2_w"] = nrm((ffn, d))
        p[f"{pre}_fc2_b"] = jnp.zeros((d,), PARAM_DTYPE)

    def ln_params(pre):
        p[pre + "_g"] = jnp.ones((d,), jnp.float32)
        p[pre + "_b"] = jnp.zeros((d,), jnp.float32)

    for li in range(cfg["n_enc_layers"]):
        pre = f"enc{li}"
        self_attn_params(pre + "_sa")
        ffn_params(pre)
        ln_params(pre + "_ln1")
        ln_params(pre + "_ln2")

    for li in range(cfg["n_dec_layers"]):
        pre = f"dec{li}"
        self_attn_params(pre + "_sa")
        cross_attn_params(pre + "_ca")
        ffn_params(pre)
        ln_params(pre + "_ln1")
        ln_params(pre + "_ln2")
        ln_params(pre + "_ln3")

    # nn.Linear(d_model, tgt_vocab, bias=False)  (share_tgt_emb_and_out=False)
    p["out_w"] = nrm((d, cfg["tgt_vocab"]))
    return p


# --------------------------------- main --------------------------------------

if __name__ == "__main__":
    cfg = dict(
        d_model=32, n_heads=4, ffn_dim=64,
        n_enc_layers=2, n_dec_layers=2,
        src_vocab=64, tgt_vocab=64,
        max_pos=32, pad_idx=1, init_std=0.02,
    )

    root = jax.random.PRNGKey(0)
    kp, k1, k2 = jax.random.split(root, 3)
    params = init_params(kp, cfg)

    B, Ts, Tt = 2, 8, 8
    input_ids = jax.random.randint(k1, (B, Ts), 2, cfg["src_vocab"], dtype=jnp.int32)
    decoder_input_ids = jax.random.randint(k2, (B, Tt), 2, cfg["tgt_vocab"], dtype=jnp.int32)

    # pad out the tail of each sequence
    attention_mask = jnp.ones((B, Ts), jnp.int32).at[:, -2:].set(0)
    decoder_attention_mask = jnp.ones((B, Tt), jnp.int32).at[:, -1:].set(0)
    input_ids = jnp.where(attention_mask == 1, input_ids, cfg["pad_idx"])
    decoder_input_ids = jnp.where(decoder_attention_mask == 1, decoder_input_ids, cfg["pad_idx"])

    fwd = jax.jit(lambda p, a, b, c, d: bart_seq2seq_forward(p, cfg, a, b, c, d))
    logits = fwd(params, input_ids, attention_mask, decoder_input_ids, decoder_attention_mask)
    jax.block_until_ready(logits)

    assert logits.shape == (B, Tt, cfg["tgt_vocab"]), logits.shape
    assert bool(jnp.all(jnp.isfinite(logits)))
    print("KERNEL_OK")
</pallas_src>

<mosaic_0001>
module attributes {stable_mosaic.version = 11 : i64} {
  func.func @kernel(%arg0: i32, %arg1: memref<16x32xbf16, #tpu.memory_space<vmem>>, %arg2: memref<1x32xf32, #tpu.memory_space<vmem>>, %arg3: memref<1x32xf32, #tpu.memory_space<vmem>>, %arg4: memref<16x32xbf16, #tpu.memory_space<vmem>>) attributes {dimension_semantics = [#tpu.dimension_semantics<parallel>], iteration_bounds = array<i64: 1>, scalar_prefetch = 0 : i64, scratch_operands = 0 : i64, tpu.core_type = #tpu.core_type<tc>, window_params = [{transform_indices = @transform_0, window_bounds = array<i64: 16, 32>}, {pipeline_mode = #tpu.pipeline_mode<synchronous>, transform_indices = @transform_1, window_bounds = array<i64: 1, 32>}, {pipeline_mode = #tpu.pipeline_mode<synchronous>, transform_indices = @transform_2, window_bounds = array<i64: 1, 32>}, {transform_indices = @transform_3, window_bounds = array<i64: 16, 32>}]} {
    %c0 = arith.constant 0 : index
    %c0_0 = arith.constant 0 : index
    %0 = vector.load %arg1[%c0, %c0_0] : memref<16x32xbf16, #tpu.memory_space<vmem>>, vector<16x32xbf16>
    %1 = arith.extf %0 : vector<16x32xbf16> to vector<16x32xf32>
    %cst = arith.constant dense<0.000000e+00> : vector<16xf32>
    %2 = vector.multi_reduction <add>, %1, %cst [1] : vector<16x32xf32> to vector<16xf32>
    %3 = vector.shape_cast %2 : vector<16xf32> to vector<16x1xf32>
    %cst_1 = arith.constant 3.200000e+01 : f32
    %4 = vector.broadcast %cst_1 : f32 to vector<16x1xf32>
    %5 = arith.divf %3, %4 : vector<16x1xf32>
    %6 = vector.broadcast %5 : vector<16x1xf32> to vector<16x32xf32>
    %7 = arith.subf %1, %6 : vector<16x32xf32>
    %8 = arith.mulf %7, %7 : vector<16x32xf32>
    %cst_2 = arith.constant dense<0.000000e+00> : vector<16xf32>
    %9 = vector.multi_reduction <add>, %8, %cst_2 [1] : vector<16x32xf32> to vector<16xf32>
    %10 = vector.shape_cast %9 : vector<16xf32> to vector<16x1xf32>
    %cst_3 = arith.constant 3.200000e+01 : f32
    %11 = vector.broadcast %cst_3 : f32 to vector<16x1xf32>
    %12 = arith.divf %10, %11 : vector<16x1xf32>
    %13 = vector.broadcast %5 : vector<16x1xf32> to vector<16x32xf32>
    %14 = arith.subf %1, %13 : vector<16x32xf32>
    %cst_4 = arith.constant 9.99999974E-6 : f32
    %15 = vector.broadcast %cst_4 : f32 to vector<16x1xf32>
    %16 = arith.addf %12, %15 : vector<16x1xf32>
    %17 = math.rsqrt %16 : vector<16x1xf32>
    %18 = vector.broadcast %17 : vector<16x1xf32> to vector<16x32xf32>
    %19 = arith.mulf %14, %18 : vector<16x32xf32>
    %c0_5 = arith.constant 0 : index
    %c0_6 = arith.constant 0 : index
    %20 = vector.load %arg2[%c0_5, %c0_6] : memref<1x32xf32, #tpu.memory_space<vmem>>, vector<1x32xf32>
    %21 = vector.broadcast %20 : vector<1x32xf32> to vector<16x32xf32>
    %22 = arith.mulf %19, %21 : vector<16x32xf32>
    %c0_7 = arith.constant 0 : index
    %c0_8 = arith.constant 0 : index
    %23 = vector.load %arg3[%c0_7, %c0_8] : memref<1x32xf32, #tpu.memory_space<vmem>>, vector<1x32xf32>
    %24 = vector.broadcast %23 : vector<1x32xf32> to vector<16x32xf32>
    %25 = arith.addf %22, %24 : vector<16x32xf32>
    %26 = arith.truncf %25 : vector<16x32xf32> to vector<16x32xbf16>
    %c0_9 = arith.constant 0 : index
    %c0_10 = arith.constant 0 : index
    %27 = vector.load %arg4[%c0_9, %c0_10] : memref<16x32xbf16, #tpu.memory_space<vmem>>, vector<16x32xbf16>
    tpu.vector_store %arg4[%c0_9, %c0_10], %26 {strides = array<i32>} : memref<16x32xbf16, #tpu.memory_space<vmem>>, vector<16x32xbf16>,
    return
  }
  func.func @transform_0(%arg0: i32) -> (i32, i32) {
    %c0_i32 = arith.constant 0 : i32
    %c0_i32_0 = arith.constant 0 : i32
    return %arg0, %c0_i32 : i32, i32
  }
  func.func @transform_1(%arg0: i32) -> (i32, i32) {
    %c0_i32 = arith.constant 0 : i32
    %c0_i32_0 = arith.constant 0 : i32
    %c0_i32_1 = arith.constant 0 : i32
    return %c0_i32, %c0_i32_0 : i32, i32
  }
  func.func @transform_2(%arg0: i32) -> (i32, i32) {
    %c0_i32 = arith.constant 0 : i32
    %c0_i32_0 = arith.constant 0 : i32
    %c0_i32_1 = arith.constant 0 : i32
    return %c0_i32, %c0_i32_0 : i32, i32
  }
  func.func @transform_3(%arg0: i32) -> (i32, i32) {
    %c0_i32 = arith.constant 0 : i32
    %c0_i32_0 = arith.constant 0 : i32
    return %arg0, %c0_i32 : i32, i32
  }
}

module attributes {stable_mosaic.version = 11 : i64} {
  func.func @kernel(%arg0: i32, %arg1: i32, %arg2: i32, %arg3: memref<16x32xbf16, #tpu.memory_space<vmem>>, %arg4: memref<32x96xbf16, #tpu.memory_space<vmem>>, %arg5: memref<1x96xbf16, #tpu.memory_space<vmem>>, %arg6: memref<16x96xbf16, #tpu.memory_space<vmem>>, %arg7: memref<16x96xf32, #tpu.memory_space<vmem>>) attributes {dimension_semantics = [#tpu.dimension_semantics<parallel>, #tpu.dimension_semantics<parallel>, #tpu.dimension_semantics<arbitrary>], iteration_bounds = array<i64: 1, 1, 1>, scalar_prefetch = 0 : i64, scratch_operands = 1 : i64, tpu.core_type = #tpu.core_type<tc>, window_params = [{transform_indices = @transform_0, window_bounds = array<i64: 16, 32>}, {transform_indices = @transform_1, window_bounds = array<i64: 32, 96>}, {transform_indices = @transform_2, window_bounds = array<i64: 1, 96>}, {transform_indices = @transform_3, window_bounds = array<i64: 16, 96>}]} {
    %c0_i32 = arith.constant 0 : i32
    %0 = arith.cmpi eq, %arg2, %c0_i32 : i32
    %1 = arith.extui %0 : i1 to i32
    %c0_i32_0 = arith.constant 0 : i32
    %2 = arith.cmpi ne, %1, %c0_i32_0 : i32
    scf.if %2 {
      %cst_10 = arith.constant 0.000000e+00 : f32
      %12 = vector.broadcast %cst_10 : f32 to vector<16x96xf32>
      %c0_11 = arith.constant 0 : index
      %c0_12 = arith.constant 0 : index
      %13 = vector.load %arg7[%c0_11, %c0_12] : memref<16x96xf32, #tpu.memory_space<vmem>>, vector<16x96xf32>
      tpu.vector_store %arg7[%c0_11, %c0_12], %12 {strides = array<i32>} : memref<16x96xf32, #tpu.memory_space<vmem>>, vector<16x96xf32>,
    } else {
    }
    %c0 = arith.constant 0 : index
    %c0_1 = arith.constant 0 : index
    %3 = vector.load %arg7[%c0, %c0_1] : memref<16x96xf32, #tpu.memory_space<vmem>>, vector<16x96xf32>
    %c0_2 = arith.constant 0 : index
    %c0_3 = arith.constant 0 : index
    %4 = vector.load %arg3[%c0_2, %c0_3] : memref<16x32xbf16, #tpu.memory_space<vmem>>, vector<16x32xbf16>
    %c0_4 = arith.constant 0 : index
    %c0_5 = arith.constant 0 : index
    %5 = vector.load %arg4[%c0_4, %c0_5] : memref<32x96xbf16, #tpu.memory_space<vmem>>, vector<32x96xbf16>
    %cst = arith.constant dense<0.000000e+00> : vector<16x96xf32>
    %6 = tpu.matmul %4, %5, %cst {dimension_numbers = #tpu.dot_dimension_numbers<[1], [0], [0], [1], [0, 0, 1, 1], [], []>} : vector<16x32xbf16>, vector<32x96xbf16>, vector<16x96xf32> -> vector<16x96xf32>
    %7 = arith.addf %3, %6 : vector<16x96xf32>
    %c0_6 = arith.constant 0 : index
    %c0_7 = arith.constant 0 : index
    %8 = vector.load %arg7[%c0_6, %c0_7] : memref<16x96xf32, #tpu.memory_space<vmem>>, vector<16x96xf32>
    tpu.vector_store %arg7[%c0_6, %c0_7], %7 {strides = array<i32>} : memref<16x96xf32, #tpu.memory_space<vmem>>, vector<16x96xf32>,
    %c0_i32_8 = arith.constant 0 : i32
    %9 = arith.cmpi eq, %arg2, %c0_i32_8 : i32
    %10 = arith.extui %9 : i1 to i32
    %c0_i32_9 = arith.constant 0 : i32
    %11 = arith.cmpi ne, %10, %c0_i32_9 : i32
    scf.if %11 {
      %c0_10 = arith.constant 0 : index
      %c0_11 = arith.constant 0 : index
      %12 = vector.load %arg7[%c0_10, %c0_11] : memref<16x96xf32, #tpu.memory_space<vmem>>, vector<16x96xf32>
      %c0_12 = arith.constant 0 : index
      %c0_13 = arith.constant 0 : index
      %13 = vector.load %arg5[%c0_12, %c0_13] : memref<1x96xbf16, #tpu.memory_space<vmem>>, vector<1x96xbf16>
      %14 = arith.extf %13 : vector<1x96xbf16> to vector<1x96xf32>
      %15 = vector.broadcast %14 : vector<1x96xf32> to vector<16x96xf32>
      %16 = arith.addf %12, %15 : vector<16x96xf32>
      %17 = arith.truncf %16 : vector<16x96xf32> to vector<16x96xbf16>
      %c0_14 = arith.constant 0 : index
      %c0_15 = arith.constant 0 : index
      %18 = vector.load %arg6[%c0_14, %c0_15] : memref<16x96xbf16, #tpu.memory_space<vmem>>, vector<16x96xbf16>
      tpu.vector_store %arg6[%c0_14, %c0_15], %17 {strides = array<i32>} : memref<16x96xbf16, #tpu.memory_space<vmem>>, vector<16x96xbf16>,
    } else {
    }
    return
  }
  func.func @transform_0(%arg0: i32, %arg1: i32, %arg2: i32) -> (i32, i32) {
    %c0_i32 = arith.constant 0 : i32
    return %arg0, %arg2 : i32, i32
  }
  func.func @transform_1(%arg0: i32, %arg1: i32, %arg2: i32) -> (i32, i32) {
    %c0_i32 = arith.constant 0 : i32
    return %arg2, %arg1 : i32, i32
  }
  func.func @transform_2(%arg0: i32, %arg1: i32, %arg2: i32) -> (i32, i32) {
    %c0_i32 = arith.constant 0 : i32
    %c0_i32_0 = arith.constant 0 : i32
    return %c0_i32, %arg1 : i32, i32
  }
  func.func @transform_3(%arg0: i32, %arg1: i32, %arg2: i32) -> (i32, i32) {
    %c0_i32 = arith.constant 0 : i32
    return %arg0, %arg1 : i32, i32
  }
}

module attributes {stable_mosaic.version = 11 : i64} {
  func.func @kernel(%arg0: i32, %arg1: memref<1x8x32xbf16, #tpu.memory_space<vmem>>, %arg2: memref<1x8x32xbf16, #tpu.memory_space<vmem>>, %arg3: memref<1x8x32xbf16, #tpu.memory_space<vmem>>, %arg4: memref<1x1x8xf32, #tpu.memory_space<vmem>>, %arg5: memref<1x8x32xbf16, #tpu.memory_space<vmem>>) attributes {dimension_semantics = [#tpu.dimension_semantics<parallel>], iteration_bounds = array<i64: 2>, scalar_prefetch = 0 : i64, scratch_operands = 0 : i64, tpu.core_type = #tpu.core_type<tc>, window_params = [{transform_indices = @transform_0, window_bounds = array<i64: 1, 8, 32>}, {transform_indices = @transform_1, window_bounds = array<i64: 1, 8, 32>}, {transform_indices = @transform_2, window_bounds = array<i64: 1, 8, 32>}, {transform_indices = @transform_3, window_bounds = array<i64: 1, 1, 8>}, {transform_indices = @transform_4, window_bounds = array<i64: 1, 8, 32>}]} {
    %c0 = arith.constant 0 : index
    %c0_0 = arith.constant 0 : index
    %c0_1 = arith.constant 0 : index
    %0 = vector.load %arg1[%c0, %c0_0, %c0_1] : memref<1x8x32xbf16, #tpu.memory_space<vmem>>, vector<1x8x32xbf16>
    %1 = vector.shape_cast %0 : vector<1x8x32xbf16> to vector<8x32xbf16>
    %c0_2 = arith.constant 0 : index
    %c0_3 = arith.constant 0 : index
    %c0_4 = arith.constant 0 : index
    %2 = vector.load %arg2[%c0_2, %c0_3, %c0_4] : memref<1x8x32xbf16, #tpu.memory_space<vmem>>, vector<1x8x32xbf16>
    %3 = vector.shape_cast %2 : vector<1x8x32xbf16> to vector<8x32xbf16>
    %c0_5 = arith.constant 0 : index
    %c0_6 = arith.constant 0 : index
    %c0_7 = arith.constant 0 : index
    %4 = vector.load %arg3[%c0_5, %c0_6, %c0_7] : memref<1x8x32xbf16, #tpu.memory_space<vmem>>, vector<1x8x32xbf16>
    %5 = vector.shape_cast %4 : vector<1x8x32xbf16> to vector<8x32xbf16>
    %c0_8 = arith.constant 0 : index
    %c0_9 = arith.constant 0 : index
    %c0_10 = arith.constant 0 : index
    %6 = vector.load %arg4[%c0_8, %c0_9, %c0_10] : memref<1x1x8xf32, #tpu.memory_space<vmem>>, vector<1x1x8xf32>
    %7 = vector.shape_cast %6 : vector<1x1x8xf32> to vector<1x8xf32>
    %cst = arith.constant 1.000000e+00 : f32
    %8 = vector.broadcast %cst : f32 to vector<1x8xf32>
    %9 = arith.subf %8, %7 : vector<1x8xf32>
    %cst_11 = arith.constant -1.000000e+09 : f32
    %10 = vector.broadcast %cst_11 : f32 to vector<1x8xf32>
    %11 = arith.mulf %9, %10 : vector<1x8xf32>
    %12 = vector.extract_strided_slice %1 {offsets = [0, 0], sizes = [8, 8], strides = [1, 1]} : vector<8x32xbf16> to vector<8x8xbf16>
    %13 = vector.extract_strided_slice %3 {offsets = [0, 0], sizes = [8, 8], strides = [1, 1]} : vector<8x32xbf16> to vector<8x8xbf16>
    %14 = vector.extract_strided_slice %5 {offsets = [0, 0], sizes = [8, 8], strides = [1, 1]} : vector<8x32xbf16> to vector<8x8xbf16>
    %15 = tpu.transpose %13, [1, 0] : vector<8x8xbf16> -> vector<8x8xbf16>
    %cst_12 = arith.constant dense<0.000000e+00> : vector<8x8xf32>
    %16 = tpu.matmul %12, %15, %cst_12 {dimension_numbers = #tpu.dot_dimension_numbers<[1], [0], [0], [1], [0, 0, 1, 1], [], []>} : vector<8x8xbf16>, vector<8x8xbf16>, vector<8x8xf32> -> vector<8x8xf32>
    %cst_13 = arith.constant 0.353553385 : f32
    %17 = vector.broadcast %cst_13 : f32 to vector<8x8xf32>
    %18 = arith.mulf %16, %17 : vector<8x8xf32>
    %19 = vector.broadcast %11 : vector<1x8xf32> to vector<8x8xf32>
    %20 = arith.addf %18, %19 : vector<8x8xf32>
    %cst_14 = arith.constant dense<0xFF800000> : vector<8xf32>
    %21 = vector.multi_reduction <maximumf>, %20, %cst_14 [1] : vector<8x8xf32> to vector<8xf32>
    %22 = vector.shape_cast %21 : vector<8xf32> to vector<8x1xf32>
    %23 = vector.broadcast %22 : vector<8x1xf32> to vector<8x8xf32>
    %24 = arith.subf %20, %23 : vector<8x8xf32>
    %25 = math.exp %24 : vector<8x8xf32>
    %cst_15 = arith.constant dense<0.000000e+00> : vector<8xf32>
    %26 = vector.multi_reduction <add>, %25, %cst_15 [1] : vector<8x8xf32> to vector<8xf32>
    %27 = vector.shape_cast %26 : vector<8xf32> to vector<8x1xf32>
    %28 = tpu.reciprocal %27 {approx = true} : vector<8x1xf32> -> vector<8x1xf32>
    %29 = vector.broadcast %28 : vector<8x1xf32> to vector<8x8xf32>
    %30 = arith.mulf %25, %29 : vector<8x8xf32>
    %31 = arith.truncf %30 : vector<8x8xf32> to vector<8x8xbf16>
    %cst_16 = arith.constant dense<0.000000e+00> : vector<8x8xf32>
    %32 = tpu.matmul %31, %14, %cst_16 {dimension_numbers = #tpu.dot_dimension_numbers<[1], [0], [0], [1], [0, 0, 1, 1], [], []>} : vector<8x8xbf16>, vector<8x8xbf16>, vector<8x8xf32> -> vector<8x8xf32>
    %33 = vector.extract_strided_slice %1 {offsets = [0, 8], sizes = [8, 8], strides = [1, 1]} : vector<8x32xbf16> to vector<8x8xbf16>
    %34 = vector.extract_strided_slice %3 {offsets = [0, 8], sizes = [8, 8], strides = [1, 1]} : vector<8x32xbf16> to vector<8x8xbf16>
    %35 = vector.extract_strided_slice %5 {offsets = [0, 8], sizes = [8, 8], strides = [1, 1]} : vector<8x32xbf16> to vector<8x8xbf16>
    %36 = tpu.transpose %34, [1, 0] : vector<8x8xbf16> -> vector<8x8xbf16>
    %cst_17 = arith.constant dense<0.000000e+00> : vector<8x8xf32>
    %37 = tpu.matmul %33, %36, %cst_17 {dimension_numbers = #tpu.dot_dimension_numbers<[1], [0], [0], [1], [0, 0, 1, 1], [], []>} : vector<8x8xbf16>, vector<8x8xbf16>, vector<8x8xf32> -> vector<8x8xf32>
    %cst_18 = arith.constant 0.353553385 : f32
    %38 = vector.broadcast %cst_18 : f32 to vector<8x8xf32>
    %39 = arith.mulf %37, %38 : vector<8x8xf32>
    %40 = vector.broadcast %11 : vector<1x8xf32> to vector<8x8xf32>
    %41 = arith.addf %39, %40 : vector<8x8xf32>
    %cst_19 = arith.constant dense<0xFF800000> : vector<8xf32>
    %42 = vector.multi_reduction <maximumf>, %41, %cst_19 [1] : vector<8x8xf32> to vector<8xf32>
    %43 = vector.shape_cast %42 : vector<8xf32> to vector<8x1xf32>
    %44 = vector.broadcast %43 : vector<8x1xf32> to vector<8x8xf32>
    %45 = arith.subf %41, %44 : vector<8x8xf32>
    %46 = math.exp %45 : vector<8x8xf32>
    %cst_20 = arith.constant dense<0.000000e+00> : vector<8xf32>
    %47 = vector.multi_reduction <add>, %46, %cst_20 [1] : vector<8x8xf32> to vector<8xf32>
    %48 = vector.shape_cast %47 : vector<8xf32> to vector<8x1xf32>
    %49 = tpu.reciprocal %48 {approx = true} : vector<8x1xf32> -> vector<8x1xf32>
    %50 = vector.broadcast %49 : vector<8x1xf32> to vector<8x8xf32>
    %51 = arith.mulf %46, %50 : vector<8x8xf32>
    %52 = arith.truncf %51 : vector<8x8xf32> to vector<8x8xbf16>
    %cst_21 = arith.constant dense<0.000000e+00> : vector<8x8xf32>
    %53 = tpu.matmul %52, %35, %cst_21 {dimension_numbers = #tpu.dot_dimension_numbers<[1], [0], [0], [1], [0, 0, 1, 1], [], []>} : vector<8x8xbf16>, vector<8x8xbf16>, vector<8x8xf32> -> vector<8x8xf32>
    %54 = vector.extract_strided_slice %1 {offsets = [0, 16], sizes = [8, 8], strides = [1, 1]} : vector<8x32xbf16> to vector<8x8xbf16>
    %55 = vector.extract_strided_slice %3 {offsets = [0, 16], sizes = [8, 8], strides = [1, 1]} : vector<8x32xbf16> to vector<8x8xbf16>
    %56 = vector.extract_strided_slice %5 {offsets = [0, 16], sizes = [8, 8], strides = [1, 1]} : vector<8x32xbf16> to vector<8x8xbf16>
    %57 = tpu.transpose %55, [1, 0] : vector<8x8xbf16> -> vector<8x8xbf16>
    %cst_22 = arith.constant dense<0.000000e+00> : vector<8x8xf32>
    %58 = tpu.matmul %54, %57, %cst_22 {dimension_numbers = #tpu.dot_dimension_numbers<[1], [0], [0], [1], [0, 0, 1, 1], [], []>} : vector<8x8xbf16>, vector<8x8xbf16>, vector<8x8xf32> -> vector<8x8xf32>
    %cst_23 = arith.constant 0.353553385 : f32
    %59 = vector.broadcast %cst_23 : f32 to vector<8x8xf32>
    %60 = arith.mulf %58, %59 : vector<8x8xf32>
    %61 = vector.broadcast %11 : vector<1x8xf32> to vector<8x8xf32>
    %62 = arith.addf %60, %61 : vector<8x8xf32>
    %cst_24 = arith.constant dense<0xFF800000> : vector<8xf32>
    %63 = vector.multi_reduction <maximumf>, %62, %cst_24 [1] : vector<8x8xf32> to vector<8xf32>
    %64 = vector.shape_cast %63 : vector<8xf32> to vector<8x1xf32>
    %65 = vector.broadcast %64 : vector<8x1xf32> to vector<8x8xf32>
    %66 = arith.subf %62, %65 : vector<8x8xf32>
    %67 = math.exp %66 : vector<8x8xf32>
    %cst_25 = arith.constant dense<0.000000e+00> : vector<8xf32>
    %68 = vector.multi_reduction <add>, %67, %cst_25 [1] : vector<8x8xf32> to vector<8xf32>
    %69 = vector.shape_cast %68 : vector<8xf32> to vector<8x1xf32>
    %70 = tpu.reciprocal %69 {approx = true} : vector<8x1xf32> -> vector<8x1xf32>
    %71 = vector.broadcast %70 : vector<8x1xf32> to vector<8x8xf32>
    %72 = arith.mulf %67, %71 : vector<8x8xf32>
    %73 = arith.truncf %72 : vector<8x8xf32> to vector<8x8xbf16>
    %cst_26 = arith.constant dense<0.000000e+00> : vector<8x8xf32>
    %74 = tpu.matmul %73, %56, %cst_26 {dimension_numbers = #tpu.dot_dimension_numbers<[1], [0], [0], [1], [0, 0, 1, 1], [], []>} : vector<8x8xbf16>, vector<8x8xbf16>, vector<8x8xf32> -> vector<8x8xf32>
    %75 = vector.extract_strided_slice %1 {offsets = [0, 24], sizes = [8, 8], strides = [1, 1]} : vector<8x32xbf16> to vector<8x8xbf16>
    %76 = vector.extract_strided_slice %3 {offsets = [0, 24], sizes = [8, 8], strides = [1, 1]} : vector<8x32xbf16> to vector<8x8xbf16>
    %77 = vector.extract_strided_slice %5 {offsets = [0, 24], sizes = [8, 8], strides = [1, 1]} : vector<8x32xbf16> to vector<8x8xbf16>
    %78 = tpu.transpose %76, [1, 0] : vector<8x8xbf16> -> vector<8x8xbf16>
    %cst_27 = arith.constant dense<0.000000e+00> : vector<8x8xf32>
    %79 = tpu.matmul %75, %78, %cst_27 {dimension_numbers = #tpu.dot_dimension_numbers<[1], [0], [0], [1], [0, 0, 1, 1], [], []>} : vector<8x8xbf16>, vector<8x8xbf16>, vector<8x8xf32> -> vector<8x8xf32>
    %cst_28 = arith.constant 0.353553385 : f32
    %80 = vector.broadcast %cst_28 : f32 to vector<8x8xf32>
    %81 = arith.mulf %79, %80 : vector<8x8xf32>
    %82 = vector.broadcast %11 : vector<1x8xf32> to vector<8x8xf32>
    %83 = arith.addf %81, %82 : vector<8x8xf32>
    %cst_29 = arith.constant dense<0xFF800000> : vector<8xf32>
    %84 = vector.multi_reduction <maximumf>, %83, %cst_29 [1] : vector<8x8xf32> to vector<8xf32>
    %85 = vector.shape_cast %84 : vector<8xf32> to vector<8x1xf32>
    %86 = vector.broadcast %85 : vector<8x1xf32> to vector<8x8xf32>
    %87 = arith.subf %83, %86 : vector<8x8xf32>
    %88 = math.exp %87 : vector<8x8xf32>
    %cst_30 = arith.constant dense<0.000000e+00> : vector<8xf32>
    %89 = vector.multi_reduction <add>, %88, %cst_30 [1] : vector<8x8xf32> to vector<8xf32>
    %90 = vector.shape_cast %89 : vector<8xf32> to vector<8x1xf32>
    %91 = tpu.reciprocal %90 {approx = true} : vector<8x1xf32> -> vector<8x1xf32>
    %92 = vector.broadcast %91 : vector<8x1xf32> to vector<8x8xf32>
    %93 = arith.mulf %88, %92 : vector<8x8xf32>
    %94 = arith.truncf %93 : vector<8x8xf32> to vector<8x8xbf16>
    %cst_31 = arith.constant dense<0.000000e+00> : vector<8x8xf32>
    %95 = tpu.matmul %94, %77, %cst_31 {dimension_numbers = #tpu.dot_dimension_numbers<[1], [0], [0], [1], [0, 0, 1, 1], [], []>} : vector<8x8xbf16>, vector<8x8xbf16>, vector<8x8xf32> -> vector<8x8xf32>
    %96 = tpu.concatenate %32, %53, %74, %95 in 1 : vector<8x8xf32>, vector<8x8xf32>, vector<8x8xf32>, vector<8x8xf32> -> vector<8x32xf32>
    %97 = arith.truncf %96 : vector<8x32xf32> to vector<8x32xbf16>
    %c0_32 = arith.constant 0 : index
    %c0_33 = arith.constant 0 : index
    %c0_34 = arith.constant 0 : index
    %98 = vector.load %arg5[%c0_32, %c0_33, %c0_34] : memref<1x8x32xbf16, #tpu.memory_space<vmem>>, vector<1x8x32xbf16>
    %99 = vector.shape_cast %98 : vector<1x8x32xbf16> to vector<8x32xbf16>
    %100 = vector.shape_cast %97 : vector<8x32xbf16> to vector<1x8x32xbf16>
    tpu.vector_store %arg5[%c0_32, %c0_33, %c0_34], %100 {strides = array<i32>} : memref<1x8x32xbf16, #tpu.memory_space<vmem>>, vector<1x8x32xbf16>,
    return
  }
  func.func @transform_0(%arg0: i32) -> (i32, i32, i32) {
    %c0_i32 = arith.constant 0 : i32
    %c0_i32_0 = arith.constant 0 : i32
    %c0_i32_1 = arith.constant 0 : i32
    return %arg0, %c0_i32, %c0_i32_0 : i32, i32, i32
  }
  func.func @transform_1(%arg0: i32) -> (i32, i32, i32) {
    %c0_i32 = arith.constant 0 : i32
    %c0_i32_0 = arith.constant 0 : i32
    %c0_i32_1 = arith.constant 0 : i32
    return %arg0, %c0_i32, %c0_i32_0 : i32, i32, i32
  }
  func.func @transform_2(%arg0: i32) -> (i32, i32, i32) {
    %c0_i32 = arith.constant 0 : i32
    %c0_i32_0 = arith.constant 0 : i32
    %c0_i32_1 = arith.constant 0 : i32
    return %arg0, %c0_i32, %c0_i32_0 : i32, i32, i32
  }
  func.func @transform_3(%arg0: i32) -> (i32, i32, i32) {
    %c0_i32 = arith.constant 0 : i32
    %c0_i32_0 = arith.constant 0 : i32
    %c0_i32_1 = arith.constant 0 : i32
    return %arg0, %c0_i32, %c0_i32_0 : i32, i32, i32
  }
  func.func @transform_4(%arg0: i32) -> (i32, i32, i32) {
    %c0_i32 = arith.constant 0 : i32
    %c0_i32_0 = arith.constant 0 : i32
    %c0_i32_1 = arith.constant 0 : i32
    return %arg0, %c0_i32, %c0_i32_0 : i32, i32, i32
  }
}

module attributes {stable_mosaic.version = 11 : i64} {
  func.func @kernel(%arg0: i32, %arg1: i32, %arg2: i32, %arg3: memref<16x32xbf16, #tpu.memory_space<vmem>>, %arg4: memref<32x32xbf16, #tpu.memory_space<vmem>>, %arg5: memref<1x32xbf16, #tpu.memory_space<vmem>>, %arg6: memref<16x32xbf16, #tpu.memory_space<vmem>>, %arg7: memref<16x32xf32, #tpu.memory_space<vmem>>) attributes {dimension_semantics = [#tpu.dimension_semantics<parallel>, #tpu.dimension_semantics<parallel>, #tpu.dimension_semantics<arbitrary>], iteration_bounds = array<i64: 1, 1, 1>, scalar_prefetch = 0 : i64, scratch_operands = 1 : i64, tpu.core_type = #tpu.core_type<tc>, window_params = [{transform_indices = @transform_0, window_bounds = array<i64: 16, 32>}, {transform_indices = @transform_1, window_bounds = array<i64: 32, 32>}, {transform_indices = @transform_2, window_bounds = array<i64: 1, 32>}, {transform_indices = @transform_3, window_bounds = array<i64: 16, 32>}]} {
    %c0_i32 = arith.constant 0 : i32
    %0 = arith.cmpi eq, %arg2, %c0_i32 : i32
    %1 = arith.extui %0 : i1 to i32
    %c0_i32_0 = arith.constant 0 : i32
    %2 = arith.cmpi ne, %1, %c0_i32_0 : i32
    scf.if %2 {
      %cst_10 = arith.constant 0.000000e+00 : f32
      %12 = vector.broadcast %cst_10 : f32 to vector<16x32xf32>
      %c0_11 = arith.constant 0 : index
      %c0_12 = arith.constant 0 : index
      %13 = vector.load %arg7[%c0_11, %c0_12] : memref<16x32xf32, #tpu.memory_space<vmem>>, vector<16x32xf32>
      tpu.vector_store %arg7[%c0_11, %c0_12], %12 {strides = array<i32>} : memref<16x32xf32, #tpu.memory_space<vmem>>, vector<16x32xf32>,
    } else {
    }
    %c0 = arith.constant 0 : index
    %c0_1 = arith.constant 0 : index
    %3 = vector.load %arg7[%c0, %c0_1] : memref<16x32xf32, #tpu.memory_space<vmem>>, vector<16x32xf32>
    %c0_2 = arith.constant 0 : index
    %c0_3 = arith.constant 0 : index
    %4 = vector.load %arg3[%c0_2, %c0_3] : memref<16x32xbf16, #tpu.memory_space<vmem>>, vector<16x32xbf16>
    %c0_4 = arith.constant 0 : index
    %c0_5 = arith.constant 0 : index
    %5 = vector.load %arg4[%c0_4, %c0_5] : memref<32x32xbf16, #tpu.memory_space<vmem>>, vector<32x32xbf16>
    %cst = arith.constant dense<0.000000e+00> : vector<16x32xf32>
    %6 = tpu.matmul %4, %5, %cst {dimension_numbers = #tpu.dot_dimension_numbers<[1], [0], [0], [1], [0, 0, 1, 1], [], []>} : vector<16x32xbf16>, vector<32x32xbf16>, vector<16x32xf32> -> vector<16x32xf32>
    %7 = arith.addf %3, %6 : vector<16x32xf32>
    %c0_6 = arith.constant 0 : index
    %c0_7 = arith.constant 0 : index
    %8 = vector.load %arg7[%c0_6, %c0_7] : memref<16x32xf32, #tpu.memory_space<vmem>>, vector<16x32xf32>
    tpu.vector_store %arg7[%c0_6, %c0_7], %7 {strides = array<i32>} : memref<16x32xf32, #tpu.memory_space<vmem>>, vector<16x32xf32>,
    %c0_i32_8 = arith.constant 0 : i32
    %9 = arith.cmpi eq, %arg2, %c0_i32_8 : i32
    %10 = arith.extui %9 : i1 to i32
    %c0_i32_9 = arith.constant 0 : i32
    %11 = arith.cmpi ne, %10, %c0_i32_9 : i32
    scf.if %11 {
      %c0_10 = arith.constant 0 : index
      %c0_11 = arith.constant 0 : index
      %12 = vector.load %arg7[%c0_10, %c0_11] : memref<16x32xf32, #tpu.memory_space<vmem>>, vector<16x32xf32>
      %c0_12 = arith.constant 0 : index
      %c0_13 = arith.constant 0 : index
      %13 = vector.load %arg5[%c0_12, %c0_13] : memref<1x32xbf16, #tpu.memory_space<vmem>>, vector<1x32xbf16>
      %14 = arith.extf %13 : vector<1x32xbf16> to vector<1x32xf32>
      %15 = vector.broadcast %14 : vector<1x32xf32> to vector<16x32xf32>
      %16 = arith.addf %12, %15 : vector<16x32xf32>
      %17 = arith.truncf %16 : vector<16x32xf32> to vector<16x32xbf16>
      %c0_14 = arith.constant 0 : index
      %c0_15 = arith.constant 0 : index
      %18 = vector.load %arg6[%c0_14, %c0_15] : memref<16x32xbf16, #tpu.memory_space<vmem>>, vector<16x32xbf16>
      tpu.vector_store %arg6[%c0_14, %c0_15], %17 {strides = array<i32>} : memref<16x32xbf16, #tpu.memory_space<vmem>>, vector<16x32xbf16>,
    } else {
    }
    return
  }
  func.func @transform_0(%arg0: i32, %arg1: i32, %arg2: i32) -> (i32, i32) {
    %c0_i32 = arith.constant 0 : i32
    return %arg0, %arg2 : i32, i32
  }
  func.func @transform_1(%arg0: i32, %arg1: i32, %arg2: i32) -> (i32, i32) {
    %c0_i32 = arith.constant 0 : i32
    return %arg2, %arg1 : i32, i32
  }
  func.func @transform_2(%arg0: i32, %arg1: i32, %arg2: i32) -> (i32, i32) {
    %c0_i32 = arith.constant 0 : i32
    %c0_i32_0 = arith.constant 0 : i32
    return %c0_i32, %arg1 : i32, i32
  }
  func.func @transform_3(%arg0: i32, %arg1: i32, %arg2: i32) -> (i32, i32) {
    %c0_i32 = arith.constant 0 : i32
    return %arg0, %arg1 : i32, i32
  }
}

module attributes {stable_mosaic.version = 11 : i64} {
  func.func @kernel(%arg0: i32, %arg1: memref<16x32xbf16, #tpu.memory_space<vmem>>, %arg2: memref<16x32xbf16, #tpu.memory_space<vmem>>, %arg3: memref<1x32xf32, #tpu.memory_space<vmem>>, %arg4: memref<1x32xf32, #tpu.memory_space<vmem>>, %arg5: memref<16x32xbf16, #tpu.memory_space<vmem>>) attributes {dimension_semantics = [#tpu.dimension_semantics<parallel>], iteration_bounds = array<i64: 1>, scalar_prefetch = 0 : i64, scratch_operands = 0 : i64, tpu.core_type = #tpu.core_type<tc>, window_params = [{transform_indices = @transform_0, window_bounds = array<i64: 16, 32>}, {transform_indices = @transform_1, window_bounds = array<i64: 16, 32>}, {pipeline_mode = #tpu.pipeline_mode<synchronous>, transform_indices = @transform_2, window_bounds = array<i64: 1, 32>}, {pipeline_mode = #tpu.pipeline_mode<synchronous>, transform_indices = @transform_3, window_bounds = array<i64: 1, 32>}, {transform_indices = @transform_4, window_bounds = array<i64: 16, 32>}]} {
    %c0 = arith.constant 0 : index
    %c0_0 = arith.constant 0 : index
    %0 = vector.load %arg1[%c0, %c0_0] : memref<16x32xbf16, #tpu.memory_space<vmem>>, vector<16x32xbf16>
    %1 = arith.extf %0 : vector<16x32xbf16> to vector<16x32xf32>
    %c0_1 = arith.constant 0 : index
    %c0_2 = arith.constant 0 : index
    %2 = vector.load %arg2[%c0_1, %c0_2] : memref<16x32xbf16, #tpu.memory_space<vmem>>, vector<16x32xbf16>
    %3 = arith.extf %2 : vector<16x32xbf16> to vector<16x32xf32>
    %4 = arith.addf %1, %3 : vector<16x32xf32>
    %cst = arith.constant dense<0.000000e+00> : vector<16xf32>
    %5 = vector.multi_reduction <add>, %4, %cst [1] : vector<16x32xf32> to vector<16xf32>
    %6 = vector.shape_cast %5 : vector<16xf32> to vector<16x1xf32>
    %cst_3 = arith.constant 3.200000e+01 : f32
    %7 = vector.broadcast %cst_3 : f32 to vector<16x1xf32>
    %8 = arith.divf %6, %7 : vector<16x1xf32>
    %9 = vector.broadcast %8 : vector<16x1xf32> to vector<16x32xf32>
    %10 = arith.subf %4, %9 : vector<16x32xf32>
    %11 = arith.mulf %10, %10 : vector<16x32xf32>
    %cst_4 = arith.constant dense<0.000000e+00> : vector<16xf32>
    %12 = vector.multi_reduction <add>, %11, %cst_4 [1] : vector<16x32xf32> to vector<16xf32>
    %13 = vector.shape_cast %12 : vector<16xf32> to vector<16x1xf32>
    %cst_5 = arith.constant 3.200000e+01 : f32
    %14 = vector.broadcast %cst_5 : f32 to vector<16x1xf32>
    %15 = arith.divf %13, %14 : vector<16x1xf32>
    %16 = vector.broadcast %8 : vector<16x1xf32> to vector<16x32xf32>
    %17 = arith.subf %4, %16 : vector<16x32xf32>
    %cst_6 = arith.constant 9.99999974E-6 : f32
    %18 = vector.broadcast %cst_6 : f32 to vector<16x1xf32>
    %19 = arith.addf %15, %18 : vector<16x1xf32>
    %20 = math.rsqrt %19 : vector<16x1xf32>
    %21 = vector.broadcast %20 : vector<16x1xf32> to vector<16x32xf32>
    %22 = arith.mulf %17, %21 : vector<16x32xf32>
    %c0_7 = arith.constant 0 : index
    %c0_8 = arith.constant 0 : index
    %23 = vector.load %arg3[%c0_7, %c0_8] : memref<1x32xf32, #tpu.memory_space<vmem>>, vector<1x32xf32>
    %24 = vector.broadcast %23 : vector<1x32xf32> to vector<16x32xf32>
    %25 = arith.mulf %22, %24 : vector<16x32xf32>
    %c0_9 = arith.constant 0 : index
    %c0_10 = arith.constant 0 : index
    %26 = vector.load %arg4[%c0_9, %c0_10] : memref<1x32xf32, #tpu.memory_space<vmem>>, vector<1x32xf32>
    %27 = vector.broadcast %26 : vector<1x32xf32> to vector<16x32xf32>
    %28 = arith.addf %25, %27 : vector<16x32xf32>
    %29 = arith.truncf %28 : vector<16x32xf32> to vector<16x32xbf16>
    %c0_11 = arith.constant 0 : index
    %c0_12 = arith.constant 0 : index
    %30 = vector.load %arg5[%c0_11, %c0_12] : memref<16x32xbf16, #tpu.memory_space<vmem>>, vector<16x32xbf16>
    tpu.vector_store %arg5[%c0_11, %c0_12], %29 {strides = array<i32>} : memref<16x32xbf16, #tpu.memory_space<vmem>>, vector<16x32xbf16>,
    return
  }
  func.func @transform_0(%arg0: i32) -> (i32, i32) {
    %c0_i32 = arith.constant 0 : i32
    %c0_i32_0 = arith.constant 0 : i32
    return %arg0, %c0_i32 : i32, i32
  }
  func.func @transform_1(%arg0: i32) -> (i32, i32) {
    %c0_i32 = arith.constant 0 : i32
    %c0_i32_0 = arith.constant 0 : i32
    return %arg0, %c0_i32 : i32, i32
  }
  func.func @transform_2(%arg0: i32) -> (i32, i32) {
    %c0_i32 = arith.constant 0 : i32
    %c0_i32_0 = arith.constant 0 : i32
    %c0_i32_1 = arith.constant 0 : i32
    return %c0_i32, %c0_i32_0 : i32, i32
  }
  func.func @transform_3(%arg0: i32) -> (i32, i32) {
    %c0_i32 = arith.constant 0 : i32
    %c0_i32_0 = arith.constant 0 : i32
    %c0_i32_1 = arith.constant 0 : i32
    return %c0_i32, %c0_i32_0 : i32, i32
  }
  func.func @transform_4(%arg0: i32) -> (i32, i32) {
    %c0_i32 = arith.constant 0 : i32
    %c0_i32_0 = arith.constant 0 : i32
    return %arg0, %c0_i32 : i32, i32
  }
}

module attributes {stable_mosaic.version = 11 : i64} {
  func.func @kernel(%arg0: i32, %arg1: i32, %arg2: i32, %arg3: memref<16x32xbf16, #tpu.memory_space<vmem>>, %arg4: memref<32x64xbf16, #tpu.memory_space<vmem>>, %arg5: memref<1x64xbf16, #tpu.memory_space<vmem>>, %arg6: memref<16x64xbf16, #tpu.memory_space<vmem>>, %arg7: memref<16x64xf32, #tpu.memory_space<vmem>>) attributes {dimension_semantics = [#tpu.dimension_semantics<parallel>, #tpu.dimension_semantics<parallel>, #tpu.dimension_semantics<arbitrary>], iteration_bounds = array<i64: 1, 1, 1>, scalar_prefetch = 0 : i64, scratch_operands = 1 : i64, tpu.core_type = #tpu.core_type<tc>, window_params = [{transform_indices = @transform_0, window_bounds = array<i64: 16, 32>}, {transform_indices = @transform_1, window_bounds = array<i64: 32, 64>}, {transform_indices = @transform_2, window_bounds = array<i64: 1, 64>}, {transform_indices = @transform_3, window_bounds = array<i64: 16, 64>}]} {
    %c0_i32 = arith.constant 0 : i32
    %0 = arith.cmpi eq, %arg2, %c0_i32 : i32
    %1 = arith.extui %0 : i1 to i32
    %c0_i32_0 = arith.constant 0 : i32
    %2 = arith.cmpi ne, %1, %c0_i32_0 : i32
    scf.if %2 {
      %cst_10 = arith.constant 0.000000e+00 : f32
      %12 = vector.broadcast %cst_10 : f32 to vector<16x64xf32>
      %c0_11 = arith.constant 0 : index
      %c0_12 = arith.constant 0 : index
      %13 = vector.load %arg7[%c0_11, %c0_12] : memref<16x64xf32, #tpu.memory_space<vmem>>, vector<16x64xf32>
      tpu.vector_store %arg7[%c0_11, %c0_12], %12 {strides = array<i32>} : memref<16x64xf32, #tpu.memory_space<vmem>>, vector<16x64xf32>,
    } else {
    }
    %c0 = arith.constant 0 : index
    %c0_1 = arith.constant 0 : index
    %3 = vector.load %arg7[%c0, %c0_1] : memref<16x64xf32, #tpu.memory_space<vmem>>, vector<16x64xf32>
    %c0_2 = arith.constant 0 : index
    %c0_3 = arith.constant 0 : index
    %4 = vector.load %arg3[%c0_2, %c0_3] : memref<16x32xbf16, #tpu.memory_space<vmem>>, vector<16x32xbf16>
    %c0_4 = arith.constant 0 : index
    %c0_5 = arith.constant 0 : index
    %5 = vector.load %arg4[%c0_4, %c0_5] : memref<32x64xbf16, #tpu.memory_space<vmem>>, vector<32x64xbf16>
    %cst = arith.constant dense<0.000000e+00> : vector<16x64xf32>
    %6 = tpu.matmul %4, %5, %cst {dimension_numbers = #tpu.dot_dimension_numbers<[1], [0], [0], [1], [0, 0, 1, 1], [], []>} : vector<16x32xbf16>, vector<32x64xbf16>, vector<16x64xf32> -> vector<16x64xf32>
    %7 = arith.addf %3, %6 : vector<16x64xf32>
    %c0_6 = arith.constant 0 : index
    %c0_7 = arith.constant 0 : index
    %8 = vector.load %arg7[%c0_6, %c0_7] : memref<16x64xf32, #tpu.memory_space<vmem>>, vector<16x64xf32>
    tpu.vector_store %arg7[%c0_6, %c0_7], %7 {strides = array<i32>} : memref<16x64xf32, #tpu.memory_space<vmem>>, vector<16x64xf32>,
    %c0_i32_8 = arith.constant 0 : i32
    %9 = arith.cmpi eq, %arg2, %c0_i32_8 : i32
    %10 = arith.extui %9 : i1 to i32
    %c0_i32_9 = arith.constant 0 : i32
    %11 = arith.cmpi ne, %10, %c0_i32_9 : i32
    scf.if %11 {
      %c0_10 = arith.constant 0 : index
      %c0_11 = arith.constant 0 : index
      %12 = vector.load %arg7[%c0_10, %c0_11] : memref<16x64xf32, #tpu.memory_space<vmem>>, vector<16x64xf32>
      %c0_12 = arith.constant 0 : index
      %c0_13 = arith.constant 0 : index
      %13 = vector.load %arg5[%c0_12, %c0_13] : memref<1x64xbf16, #tpu.memory_space<vmem>>, vector<1x64xbf16>
      %14 = arith.extf %13 : vector<1x64xbf16> to vector<1x64xf32>
      %15 = vector.broadcast %14 : vector<1x64xf32> to vector<16x64xf32>
      %16 = arith.addf %12, %15 : vector<16x64xf32>
      %17 = arith.mulf %16, %16 : vector<16x64xf32>
      %18 = arith.mulf %16, %17 : vector<16x64xf32>
      %cst_14 = arith.constant 4.471500e-02 : f32
      %19 = vector.broadcast %cst_14 : f32 to vector<16x64xf32>
      %20 = arith.mulf %19, %18 : vector<16x64xf32>
      %21 = arith.addf %16, %20 : vector<16x64xf32>
      %cst_15 = arith.constant 0.797884583 : f32
      %22 = vector.broadcast %cst_15 : f32 to vector<16x64xf32>
      %23 = arith.mulf %22, %21 : vector<16x64xf32>
      %24 = math.tanh %23 : vector<16x64xf32>
      %cst_16 = arith.constant 1.000000e+00 : f32
      %25 = vector.broadcast %cst_16 : f32 to vector<16x64xf32>
      %26 = arith.addf %25, %24 : vector<16x64xf32>
      %cst_17 = arith.constant 5.000000e-01 : f32
      %27 = vector.broadcast %cst_17 : f32 to vector<16x64xf32>
      %28 = arith.mulf %27, %26 : vector<16x64xf32>
      %29 = arith.mulf %16, %28 : vector<16x64xf32>
      %30 = arith.truncf %29 : vector<16x64xf32> to vector<16x64xbf16>
      %c0_18 = arith.constant 0 : index
      %c0_19 = arith.constant 0 : index
      %31 = vector.load %arg6[%c0_18, %c0_19] : memref<16x64xbf16, #tpu.memory_space<vmem>>, vector<16x64xbf16>
      tpu.vector_store %arg6[%c0_18, %c0_19], %30 {strides = array<i32>} : memref<16x64xbf16, #tpu.memory_space<vmem>>, vector<16x64xbf16>,
    } else {
    }
    return
  }
  func.func @transform_0(%arg0: i32, %arg1: i32, %arg2: i32) -> (i32, i32) {
    %c0_i32 = arith.constant 0 : i32
    return %arg0, %arg2 : i32, i32
  }
  func.func @transform_1(%arg0: i32, %arg1: i32, %arg2: i32) -> (i32, i32) {
    %c0_i32 = arith.constant 0 : i32
    return %arg2, %arg1 : i32, i32
  }
  func.func @transform_2(%arg0: i32, %arg1: i32, %arg2: i32) -> (i32, i32) {
    %c0_i32 = arith.constant 0 : i32
    %c0_i32_0 = arith.constant 0 : i32
    return %c0_i32, %arg1 : i32, i32
  }
  func.func @transform_3(%arg0: i32, %arg1: i32, %arg2: i32) -> (i32, i32) {
    %c0_i32 = arith.constant 0 : i32
    return %arg0, %arg1 : i32, i32
  }
}

module attributes {stable_mosaic.version = 11 : i64} {
  func.func @kernel(%arg0: i32, %arg1: i32, %arg2: i32, %arg3: memref<16x64xbf16, #tpu.memory_space<vmem>>, %arg4: memref<64x32xbf16, #tpu.memory_space<vmem>>, %arg5: memref<1x32xbf16, #tpu.memory_space<vmem>>, %arg6: memref<16x32xbf16, #tpu.memory_space<vmem>>, %arg7: memref<16x32xf32, #tpu.memory_space<vmem>>) attributes {dimension_semantics = [#tpu.dimension_semantics<parallel>, #tpu.dimension_semantics<parallel>, #tpu.dimension_semantics<arbitrary>], iteration_bounds = array<i64: 1, 1, 1>, scalar_prefetch = 0 : i64, scratch_operands = 1 : i64, tpu.core_type = #tpu.core_type<tc>, window_params = [{transform_indices = @transform_0, window_bounds = array<i64: 16, 64>}, {transform_indices = @transform_1, window_bounds = array<i64: 64, 32>}, {transform_indices = @transform_2, window_bounds = array<i64: 1, 32>}, {transform_indices = @transform_3, window_bounds = array<i64: 16, 32>}]} {
    %c0_i32 = arith.constant 0 : i32
    %0 = arith.cmpi eq, %arg2, %c0_i32 : i32
    %1 = arith.extui %0 : i1 to i32
    %c0_i32_0 = arith.constant 0 : i32
    %2 = arith.cmpi ne, %1, %c0_i32_0 : i32
    scf.if %2 {
      %cst_10 = arith.constant 0.000000e+00 : f32
      %12 = vector.broadcast %cst_10 : f32 to vector<16x32xf32>
      %c0_11 = arith.constant 0 : index
      %c0_12 = arith.constant 0 : index
      %13 = vector.load %arg7[%c0_11, %c0_12] : memref<16x32xf32, #tpu.memory_space<vmem>>, vector<16x32xf32>
      tpu.vector_store %arg7[%c0_11, %c0_12], %12 {strides = array<i32>} : memref<16x32xf32, #tpu.memory_space<vmem>>, vector<16x32xf32>,
    } else {
    }
    %c0 = arith.constant 0 : index
    %c0_1 = arith.constant 0 : index
    %3 = vector.load %arg7[%c0, %c0_1] : memref<16x32xf32, #tpu.memory_space<vmem>>, vector<16x32xf32>
    %c0_2 = arith.constant 0 : index
    %c0_3 = arith.constant 0 : index
    %4 = vector.load %arg3[%c0_2, %c0_3] : memref<16x64xbf16, #tpu.memory_space<vmem>>, vector<16x64xbf16>
    %c0_4 = arith.constant 0 : index
    %c0_5 = arith.constant 0 : index
    %5 = vector.load %arg4[%c0_4, %c0_5] : memref<64x32xbf16, #tpu.memory_space<vmem>>, vector<64x32xbf16>
    %cst = arith.constant dense<0.000000e+00> : vector<16x32xf32>
    %6 = tpu.matmul %4, %5, %cst {dimension_numbers = #tpu.dot_dimension_numbers<[1], [0], [0], [1], [0, 0, 1, 1], [], []>} : vector<16x64xbf16>, vector<64x32xbf16>, vector<16x32xf32> -> vector<16x32xf32>
    %7 = arith.addf %3, %6 : vector<16x32xf32>
    %c0_6 = arith.constant 0 : index
    %c0_7 = arith.constant 0 : index
    %8 = vector.load %arg7[%c0_6, %c0_7] : memref<16x32xf32, #tpu.memory_space<vmem>>, vector<16x32xf32>
    tpu.vector_store %arg7[%c0_6, %c0_7], %7 {strides = array<i32>} : memref<16x32xf32, #tpu.memory_space<vmem>>, vector<16x32xf32>,
    %c0_i32_8 = arith.constant 0 : i32
    %9 = arith.cmpi eq, %arg2, %c0_i32_8 : i32
    %10 = arith.extui %9 : i1 to i32
    %c0_i32_9 = arith.constant 0 : i32
    %11 = arith.cmpi ne, %10, %c0_i32_9 : i32
    scf.if %11 {
      %c0_10 = arith.constant 0 : index
      %c0_11 = arith.constant 0 : index
      %12 = vector.load %arg7[%c0_10, %c0_11] : memref<16x32xf32, #tpu.memory_space<vmem>>, vector<16x32xf32>
      %c0_12 = arith.constant 0 : index
      %c0_13 = arith.constant 0 : index
      %13 = vector.load %arg5[%c0_12, %c0_13] : memref<1x32xbf16, #tpu.memory_space<vmem>>, vector<1x32xbf16>
      %14 = arith.extf %13 : vector<1x32xbf16> to vector<1x32xf32>
      %15 = vector.broadcast %14 : vector<1x32xf32> to vector<16x32xf32>
      %16 = arith.addf %12, %15 : vector<16x32xf32>
      %17 = arith.truncf %16 : vector<16x32xf32> to vector<16x32xbf16>
      %c0_14 = arith.constant 0 : index
      %c0_15 = arith.constant 0 : index
      %18 = vector.load %arg6[%c0_14, %c0_15] : memref<16x32xbf16, #tpu.memory_space<vmem>>, vector<16x32xbf16>
      tpu.vector_store %arg6[%c0_14, %c0_15], %17 {strides = array<i32>} : memref<16x32xbf16, #tpu.memory_space<vmem>>, vector<16x32xbf16>,
    } else {
    }
    return
  }
  func.func @transform_0(%arg0: i32, %arg1: i32, %arg2: i32) -> (i32, i32) {
    %c0_i32 = arith.constant 0 : i32
    return %arg0, %arg2 : i32, i32
  }
  func.func @transform_1(%arg0: i32, %arg1: i32, %arg2: i32) -> (i32, i32) {
    %c0_i32 = arith.constant 0 : i32
    return %arg2, %arg1 : i32, i32
  }
  func.func @transform_2(%arg0: i32, %arg1: i32, %arg2: i32) -> (i32, i32) {
    %c0_i32 = arith.constant 0 : i32
    %c0_i32_0 = arith.constant 0 : i32
    return %c0_i32, %arg1 : i32, i32
  }
  func.func @transform_3(%arg0: i32, %arg1: i32, %arg2: i32) -> (i32, i32) {
    %c0_i32 = arith.constant 0 : i32
    return %arg0, %arg1 : i32, i32
  }
}

module attributes {stable_mosaic.version = 11 : i64} {
  func.func @kernel(%arg0: i32, %arg1: i32, %arg2: i32, %arg3: memref<16x32xbf16, #tpu.memory_space<vmem>>, %arg4: memref<32x64xbf16, #tpu.memory_space<vmem>>, %arg5: memref<1x64xbf16, #tpu.memory_space<vmem>>, %arg6: memref<16x64xbf16, #tpu.memory_space<vmem>>, %arg7: memref<16x64xf32, #tpu.memory_space<vmem>>) attributes {dimension_semantics = [#tpu.dimension_semantics<parallel>, #tpu.dimension_semantics<parallel>, #tpu.dimension_semantics<arbitrary>], iteration_bounds = array<i64: 1, 1, 1>, scalar_prefetch = 0 : i64, scratch_operands = 1 : i64, tpu.core_type = #tpu.core_type<tc>, window_params = [{transform_indices = @transform_0, window_bounds = array<i64: 16, 32>}, {transform_indices = @transform_1, window_bounds = array<i64: 32, 64>}, {transform_indices = @transform_2, window_bounds = array<i64: 1, 64>}, {transform_indices = @transform_3, window_bounds = array<i64: 16, 64>}]} {
    %c0_i32 = arith.constant 0 : i32
    %0 = arith.cmpi eq, %arg2, %c0_i32 : i32
    %1 = arith.extui %0 : i1 to i32
    %c0_i32_0 = arith.constant 0 : i32
    %2 = arith.cmpi ne, %1, %c0_i32_0 : i32
    scf.if %2 {
      %cst_10 = arith.constant 0.000000e+00 : f32
      %12 = vector.broadcast %cst_10 : f32 to vector<16x64xf32>
      %c0_11 = arith.constant 0 : index
      %c0_12 = arith.constant 0 : index
      %13 = vector.load %arg7[%c0_11, %c0_12] : memref<16x64xf32, #tpu.memory_space<vmem>>, vector<16x64xf32>
      tpu.vector_store %arg7[%c0_11, %c0_12], %12 {strides = array<i32>} : memref<16x64xf32, #tpu.memory_space<vmem>>, vector<16x64xf32>,
    } else {
    }
    %c0 = arith.constant 0 : index
    %c0_1 = arith.constant 0 : index
    %3 = vector.load %arg7[%c0, %c0_1] : memref<16x64xf32, #tpu.memory_space<vmem>>, vector<16x64xf32>
    %c0_2 = arith.constant 0 : index
    %c0_3 = arith.constant 0 : index
    %4 = vector.load %arg3[%c0_2, %c0_3] : memref<16x32xbf16, #tpu.memory_space<vmem>>, vector<16x32xbf16>
    %c0_4 = arith.constant 0 : index
    %c0_5 = arith.constant 0 : index
    %5 = vector.load %arg4[%c0_4, %c0_5] : memref<32x64xbf16, #tpu.memory_space<vmem>>, vector<32x64xbf16>
    %cst = arith.constant dense<0.000000e+00> : vector<16x64xf32>
    %6 = tpu.matmul %4, %5, %cst {dimension_numbers = #tpu.dot_dimension_numbers<[1], [0], [0], [1], [0, 0, 1, 1], [], []>} : vector<16x32xbf16>, vector<32x64xbf16>, vector<16x64xf32> -> vector<16x64xf32>
    %7 = arith.addf %3, %6 : vector<16x64xf32>
    %c0_6 = arith.constant 0 : index
    %c0_7 = arith.constant 0 : index
    %8 = vector.load %arg7[%c0_6, %c0_7] : memref<16x64xf32, #tpu.memory_space<vmem>>, vector<16x64xf32>
    tpu.vector_store %arg7[%c0_6, %c0_7], %7 {strides = array<i32>} : memref<16x64xf32, #tpu.memory_space<vmem>>, vector<16x64xf32>,
    %c0_i32_8 = arith.constant 0 : i32
    %9 = arith.cmpi eq, %arg2, %c0_i32_8 : i32
    %10 = arith.extui %9 : i1 to i32
    %c0_i32_9 = arith.constant 0 : i32
    %11 = arith.cmpi ne, %10, %c0_i32_9 : i32
    scf.if %11 {
      %c0_10 = arith.constant 0 : index
      %c0_11 = arith.constant 0 : index
      %12 = vector.load %arg7[%c0_10, %c0_11] : memref<16x64xf32, #tpu.memory_space<vmem>>, vector<16x64xf32>
      %c0_12 = arith.constant 0 : index
      %c0_13 = arith.constant 0 : index
      %13 = vector.load %arg5[%c0_12, %c0_13] : memref<1x64xbf16, #tpu.memory_space<vmem>>, vector<1x64xbf16>
      %14 = arith.extf %13 : vector<1x64xbf16> to vector<1x64xf32>
      %15 = vector.broadcast %14 : vector<1x64xf32> to vector<16x64xf32>
      %16 = arith.addf %12, %15 : vector<16x64xf32>
      %17 = arith.truncf %16 : vector<16x64xf32> to vector<16x64xbf16>
      %c0_14 = arith.constant 0 : index
      %c0_15 = arith.constant 0 : index
      %18 = vector.load %arg6[%c0_14, %c0_15] : memref<16x64xbf16, #tpu.memory_space<vmem>>, vector<16x64xbf16>
      tpu.vector_store %arg6[%c0_14, %c0_15], %17 {strides = array<i32>} : memref<16x64xbf16, #tpu.memory_space<vmem>>, vector<16x64xbf16>,
    } else {
    }
    return
  }
  func.func @transform_0(%arg0: i32, %arg1: i32, %arg2: i32) -> (i32, i32) {
    %c0_i32 = arith.constant 0 : i32
    return %arg0, %arg2 : i32, i32
  }
  func.func @transform_1(%arg0: i32, %arg1: i32, %arg2: i32) -> (i32, i32) {
    %c0_i32 = arith.constant 0 : i32
    return %arg2, %arg1 : i32, i32
  }
  func.func @transform_2(%arg0: i32, %arg1: i32, %arg2: i32) -> (i32, i32) {
    %c0_i32 = arith.constant 0 : i32
    %c0_i32_0 = arith.constant 0 : i32
    return %c0_i32, %arg1 : i32, i32
  }
  func.func @transform_3(%arg0: i32, %arg1: i32, %arg2: i32) -> (i32, i32) {
    %c0_i32 = arith.constant 0 : i32
    return %arg0, %arg1 : i32, i32
  }
}

module attributes {stable_mosaic.version = 11 : i64} {
  func.func @kernel(%arg0: i32, %arg1: memref<1x8x32xbf16, #tpu.memory_space<vmem>>, %arg2: memref<1x8x32xbf16, #tpu.memory_space<vmem>>, %arg3: memref<1x8x32xbf16, #tpu.memory_space<vmem>>, %arg4: memref<1x1x8xf32, #tpu.memory_space<vmem>>, %arg5: memref<1x8x32xbf16, #tpu.memory_space<vmem>>) attributes {dimension_semantics = [#tpu.dimension_semantics<parallel>], iteration_bounds = array<i64: 2>, scalar_prefetch = 0 : i64, scratch_operands = 0 : i64, tpu.core_type = #tpu.core_type<tc>, window_params = [{transform_indices = @transform_0, window_bounds = array<i64: 1, 8, 32>}, {transform_indices = @transform_1, window_bounds = array<i64: 1, 8, 32>}, {transform_indices = @transform_2, window_bounds = array<i64: 1, 8, 32>}, {transform_indices = @transform_3, window_bounds = array<i64: 1, 1, 8>}, {transform_indices = @transform_4, window_bounds = array<i64: 1, 8, 32>}]} {
    %c0 = arith.constant 0 : index
    %c0_0 = arith.constant 0 : index
    %c0_1 = arith.constant 0 : index
    %0 = vector.load %arg1[%c0, %c0_0, %c0_1] : memref<1x8x32xbf16, #tpu.memory_space<vmem>>, vector<1x8x32xbf16>
    %1 = vector.shape_cast %0 : vector<1x8x32xbf16> to vector<8x32xbf16>
    %c0_2 = arith.constant 0 : index
    %c0_3 = arith.constant 0 : index
    %c0_4 = arith.constant 0 : index
    %2 = vector.load %arg2[%c0_2, %c0_3, %c0_4] : memref<1x8x32xbf16, #tpu.memory_space<vmem>>, vector<1x8x32xbf16>
    %3 = vector.shape_cast %2 : vector<1x8x32xbf16> to vector<8x32xbf16>
    %c0_5 = arith.constant 0 : index
    %c0_6 = arith.constant 0 : index
    %c0_7 = arith.constant 0 : index
    %4 = vector.load %arg3[%c0_5, %c0_6, %c0_7] : memref<1x8x32xbf16, #tpu.memory_space<vmem>>, vector<1x8x32xbf16>
    %5 = vector.shape_cast %4 : vector<1x8x32xbf16> to vector<8x32xbf16>
    %c0_8 = arith.constant 0 : index
    %c0_9 = arith.constant 0 : index
    %c0_10 = arith.constant 0 : index
    %6 = vector.load %arg4[%c0_8, %c0_9, %c0_10] : memref<1x1x8xf32, #tpu.memory_space<vmem>>, vector<1x1x8xf32>
    %7 = vector.shape_cast %6 : vector<1x1x8xf32> to vector<1x8xf32>
    %cst = arith.constant 1.000000e+00 : f32
    %8 = vector.broadcast %cst : f32 to vector<1x8xf32>
    %9 = arith.subf %8, %7 : vector<1x8xf32>
    %cst_11 = arith.constant -1.000000e+09 : f32
    %10 = vector.broadcast %cst_11 : f32 to vector<1x8xf32>
    %11 = arith.mulf %9, %10 : vector<1x8xf32>
    %12 = tpu.iota {dimensions = array<i32: 0>} : vector<8x8xi32>
    %13 = tpu.iota {dimensions = array<i32: 1>} : vector<8x8xi32>
    %14 = arith.cmpi sgt, %13, %12 : vector<8x8xi32>
    %cst_12 = arith.constant -1.000000e+09 : f32
    %cst_13 = arith.constant 0.000000e+00 : f32
    %15 = vector.broadcast %cst_12 : f32 to vector<8x8xf32>
    %16 = vector.broadcast %cst_13 : f32 to vector<8x8xf32>
    %17 = arith.select %14, %15, %16 : vector<8x8xi1>, vector<8x8xf32>
    %18 = vector.broadcast %11 : vector<1x8xf32> to vector<8x8xf32>
    %19 = arith.addf %18, %17 : vector<8x8xf32>
    %20 = vector.extract_strided_slice %1 {offsets = [0, 0], sizes = [8, 8], strides = [1, 1]} : vector<8x32xbf16> to vector<8x8xbf16>
    %21 = vector.extract_strided_slice %3 {offsets = [0, 0], sizes = [8, 8], strides = [1, 1]} : vector<8x32xbf16> to vector<8x8xbf16>
    %22 = vector.extract_strided_slice %5 {offsets = [0, 0], sizes = [8, 8], strides = [1, 1]} : vector<8x32xbf16> to vector<8x8xbf16>
    %23 = tpu.transpose %21, [1, 0] : vector<8x8xbf16> -> vector<8x8xbf16>
    %cst_14 = arith.constant dense<0.000000e+00> : vector<8x8xf32>
    %24 = tpu.matmul %20, %23, %cst_14 {dimension_numbers = #tpu.dot_dimension_numbers<[1], [0], [0], [1], [0, 0, 1, 1], [], []>} : vector<8x8xbf16>, vector<8x8xbf16>, vector<8x8xf32> -> vector<8x8xf32>
    %cst_15 = arith.constant 0.353553385 : f32
    %25 = vector.broadcast %cst_15 : f32 to vector<8x8xf32>
    %26 = arith.mulf %24, %25 : vector<8x8xf32>
    %27 = arith.addf %26, %19 : vector<8x8xf32>
    %cst_16 = arith.constant dense<0xFF800000> : vector<8xf32>
    %28 = vector.multi_reduction <maximumf>, %27, %cst_16 [1] : vector<8x8xf32> to vector<8xf32>
    %29 = vector.shape_cast %28 : vector<8xf32> to vector<8x1xf32>
    %30 = vector.broadcast %29 : vector<8x1xf32> to vector<8x8xf32>
    %31 = arith.subf %27, %30 : vector<8x8xf32>
    %32 = math.exp %31 : vector<8x8xf32>
    %cst_17 = arith.constant dense<0.000000e+00> : vector<8xf32>
    %33 = vector.multi_reduction <add>, %32, %cst_17 [1] : vector<8x8xf32> to vector<8xf32>
    %34 = vector.shape_cast %33 : vector<8xf32> to vector<8x1xf32>
    %35 = tpu.reciprocal %34 {approx = true} : vector<8x1xf32> -> vector<8x1xf32>
    %36 = vector.broadcast %35 : vector<8x1xf32> to vector<8x8xf32>
    %37 = arith.mulf %32, %36 : vector<8x8xf32>
    %38 = arith.truncf %37 : vector<8x8xf32> to vector<8x8xbf16>
    %cst_18 = arith.constant dense<0.000000e+00> : vector<8x8xf32>
    %39 = tpu.matmul %38, %22, %cst_18 {dimension_numbers = #tpu.dot_dimension_numbers<[1], [0], [0], [1], [0, 0, 1, 1], [], []>} : vector<8x8xbf16>, vector<8x8xbf16>, vector<8x8xf32> -> vector<8x8xf32>
    %40 = vector.extract_strided_slice %1 {offsets = [0, 8], sizes = [8, 8], strides = [1, 1]} : vector<8x32xbf16> to vector<8x8xbf16>
    %41 = vector.extract_strided_slice %3 {offsets = [0, 8], sizes = [8, 8], strides = [1, 1]} : vector<8x32xbf16> to vector<8x8xbf16>
    %42 = vector.extract_strided_slice %5 {offsets = [0, 8], sizes = [8, 8], strides = [1, 1]} : vector<8x32xbf16> to vector<8x8xbf16>
    %43 = tpu.transpose %41, [1, 0] : vector<8x8xbf16> -> vector<8x8xbf16>
    %cst_19 = arith.constant dense<0.000000e+00> : vector<8x8xf32>
    %44 = tpu.matmul %40, %43, %cst_19 {dimension_numbers = #tpu.dot_dimension_numbers<[1], [0], [0], [1], [0, 0, 1, 1], [], []>} : vector<8x8xbf16>, vector<8x8xbf16>, vector<8x8xf32> -> vector<8x8xf32>
    %cst_20 = arith.constant 0.353553385 : f32
    %45 = vector.broadcast %cst_20 : f32 to vector<8x8xf32>
    %46 = arith.mulf %44, %45 : vector<8x8xf32>
    %47 = arith.addf %46, %19 : vector<8x8xf32>
    %cst_21 = arith.constant dense<0xFF800000> : vector<8xf32>
    %48 = vector.multi_reduction <maximumf>, %47, %cst_21 [1] : vector<8x8xf32> to vector<8xf32>
    %49 = vector.shape_cast %48 : vector<8xf32> to vector<8x1xf32>
    %50 = vector.broadcast %49 : vector<8x1xf32> to vector<8x8xf32>
    %51 = arith.subf %47, %50 : vector<8x8xf32>
    %52 = math.exp %51 : vector<8x8xf32>
    %cst_22 = arith.constant dense<0.000000e+00> : vector<8xf32>
    %53 = vector.multi_reduction <add>, %52, %cst_22 [1] : vector<8x8xf32> to vector<8xf32>
    %54 = vector.shape_cast %53 : vector<8xf32> to vector<8x1xf32>
    %55 = tpu.reciprocal %54 {approx = true} : vector<8x1xf32> -> vector<8x1xf32>
    %56 = vector.broadcast %55 : vector<8x1xf32> to vector<8x8xf32>
    %57 = arith.mulf %52, %56 : vector<8x8xf32>
    %58 = arith.truncf %57 : vector<8x8xf32> to vector<8x8xbf16>
    %cst_23 = arith.constant dense<0.000000e+00> : vector<8x8xf32>
    %59 = tpu.matmul %58, %42, %cst_23 {dimension_numbers = #tpu.dot_dimension_numbers<[1], [0], [0], [1], [0, 0, 1, 1], [], []>} : vector<8x8xbf16>, vector<8x8xbf16>, vector<8x8xf32> -> vector<8x8xf32>
    %60 = vector.extract_strided_slice %1 {offsets = [0, 16], sizes = [8, 8], strides = [1, 1]} : vector<8x32xbf16> to vector<8x8xbf16>
    %61 = vector.extract_strided_slice %3 {offsets = [0, 16], sizes = [8, 8], strides = [1, 1]} : vector<8x32xbf16> to vector<8x8xbf16>
    %62 = vector.extract_strided_slice %5 {offsets = [0, 16], sizes = [8, 8], strides = [1, 1]} : vector<8x32xbf16> to vector<8x8xbf16>
    %63 = tpu.transpose %61, [1, 0] : vector<8x8xbf16> -> vector<8x8xbf16>
    %cst_24 = arith.constant dense<0.000000e+00> : vector<8x8xf32>
    %64 = tpu.matmul %60, %63, %cst_24 {dimension_numbers = #tpu.dot_dimension_numbers<[1], [0], [0], [1], [0, 0, 1, 1], [], []>} : vector<8x8xbf16>, vector<8x8xbf16>, vector<8x8xf32> -> vector<8x8xf32>
    %cst_25 = arith.constant 0.353553385 : f32
    %65 = vector.broadcast %cst_25 : f32 to vector<8x8xf32>
    %66 = arith.mulf %64, %65 : vector<8x8xf32>
    %67 = arith.addf %66, %19 : vector<8x8xf32>
    %cst_26 = arith.constant dense<0xFF800000> : vector<8xf32>
    %68 = vector.multi_reduction <maximumf>, %67, %cst_26 [1] : vector<8x8xf32> to vector<8xf32>
    %69 = vector.shape_cast %68 : vector<8xf32> to vector<8x1xf32>
    %70 = vector.broadcast %69 : vector<8x1xf32> to vector<8x8xf32>
    %71 = arith.subf %67, %70 : vector<8x8xf32>
    %72 = math.exp %71 : vector<8x8xf32>
    %cst_27 = arith.constant dense<0.000000e+00> : vector<8xf32>
    %73 = vector.multi_reduction <add>, %72, %cst_27 [1] : vector<8x8xf32> to vector<8xf32>
    %74 = vector.shape_cast %73 : vector<8xf32> to vector<8x1xf32>
    %75 = tpu.reciprocal %74 {approx = true} : vector<8x1xf32> -> vector<8x1xf32>
    %76 = vector.broadcast %75 : vector<8x1xf32> to vector<8x8xf32>
    %77 = arith.mulf %72, %76 : vector<8x8xf32>
    %78 = arith.truncf %77 : vector<8x8xf32> to vector<8x8xbf16>
    %cst_28 = arith.constant dense<0.000000e+00> : vector<8x8xf32>
    %79 = tpu.matmul %78, %62, %cst_28 {dimension_numbers = #tpu.dot_dimension_numbers<[1], [0], [0], [1], [0, 0, 1, 1], [], []>} : vector<8x8xbf16>, vector<8x8xbf16>, vector<8x8xf32> -> vector<8x8xf32>
    %80 = vector.extract_strided_slice %1 {offsets = [0, 24], sizes = [8, 8], strides = [1, 1]} : vector<8x32xbf16> to vector<8x8xbf16>
    %81 = vector.extract_strided_slice %3 {offsets = [0, 24], sizes = [8, 8], strides = [1, 1]} : vector<8x32xbf16> to vector<8x8xbf16>
    %82 = vector.extract_strided_slice %5 {offsets = [0, 24], sizes = [8, 8], strides = [1, 1]} : vector<8x32xbf16> to vector<8x8xbf16>
    %83 = tpu.transpose %81, [1, 0] : vector<8x8xbf16> -> vector<8x8xbf16>
    %cst_29 = arith.constant dense<0.000000e+00> : vector<8x8xf32>
    %84 = tpu.matmul %80, %83, %cst_29 {dimension_numbers = #tpu.dot_dimension_numbers<[1], [0], [0], [1], [0, 0, 1, 1], [], []>} : vector<8x8xbf16>, vector<8x8xbf16>, vector<8x8xf32> -> vector<8x8xf32>
    %cst_30 = arith.constant 0.353553385 : f32
    %85 = vector.broadcast %cst_30 : f32 to vector<8x8xf32>
    %86 = arith.mulf %84, %85 : vector<8x8xf32>
    %87 = arith.addf %86, %19 : vector<8x8xf32>
    %cst_31 = arith.constant dense<0xFF800000> : vector<8xf32>
    %88 = vector.multi_reduction <maximumf>, %87, %cst_31 [1] : vector<8x8xf32> to vector<8xf32>
    %89 = vector.shape_cast %88 : vector<8xf32> to vector<8x1xf32>
    %90 = vector.broadcast %89 : vector<8x1xf32> to vector<8x8xf32>
    %91 = arith.subf %87, %90 : vector<8x8xf32>
    %92 = math.exp %91 : vector<8x8xf32>
    %cst_32 = arith.constant dense<0.000000e+00> : vector<8xf32>
    %93 = vector.multi_reduction <add>, %92, %cst_32 [1] : vector<8x8xf32> to vector<8xf32>
    %94 = vector.shape_cast %93 : vector<8xf32> to vector<8x1xf32>
    %95 = tpu.reciprocal %94 {approx = true} : vector<8x1xf32> -> vector<8x1xf32>
    %96 = vector.broadcast %95 : vector<8x1xf32> to vector<8x8xf32>
    %97 = arith.mulf %92, %96 : vector<8x8xf32>
    %98 = arith.truncf %97 : vector<8x8xf32> to vector<8x8xbf16>
    %cst_33 = arith.constant dense<0.000000e+00> : vector<8x8xf32>
    %99 = tpu.matmul %98, %82, %cst_33 {dimension_numbers = #tpu.dot_dimension_numbers<[1], [0], [0], [1], [0, 0, 1, 1], [], []>} : vector<8x8xbf16>, vector<8x8xbf16>, vector<8x8xf32> -> vector<8x8xf32>
    %100 = tpu.concatenate %39, %59, %79, %99 in 1 : vector<8x8xf32>, vector<8x8xf32>, vector<8x8xf32>, vector<8x8xf32> -> vector<8x32xf32>
    %101 = arith.truncf %100 : vector<8x32xf32> to vector<8x32xbf16>
    %c0_34 = arith.constant 0 : index
    %c0_35 = arith.constant 0 : index
    %c0_36 = arith.constant 0 : index
    %102 = vector.load %arg5[%c0_34, %c0_35, %c0_36] : memref<1x8x32xbf16, #tpu.memory_space<vmem>>, vector<1x8x32xbf16>
    %103 = vector.shape_cast %102 : vector<1x8x32xbf16> to vector<8x32xbf16>
    %104 = vector.shape_cast %101 : vector<8x32xbf16> to vector<1x8x32xbf16>
    tpu.vector_store %arg5[%c0_34, %c0_35, %c0_36], %104 {strides = array<i32>} : memref<1x8x32xbf16, #tpu.memory_space<vmem>>, vector<1x8x32xbf16>,
    return
  }
  func.func @transform_0(%arg0: i32) -> (i32, i32, i32) {
    %c0_i32 = arith.constant 0 : i32
    %c0_i32_0 = arith.constant 0 : i32
    %c0_i32_1 = arith.constant 0 : i32
    return %arg0, %c0_i32, %c0_i32_0 : i32, i32, i32
  }
  func.func @transform_1(%arg0: i32) -> (i32, i32, i32) {
    %c0_i32 = arith.constant 0 : i32
    %c0_i32_0 = arith.constant 0 : i32
    %c0_i32_1 = arith.constant 0 : i32
    return %arg0, %c0_i32, %c0_i32_0 : i32, i32, i32
  }
  func.func @transform_2(%arg0: i32) -> (i32, i32, i32) {
    %c0_i32 = arith.constant 0 : i32
    %c0_i32_0 = arith.constant 0 : i32
    %c0_i32_1 = arith.constant 0 : i32
    return %arg0, %c0_i32, %c0_i32_0 : i32, i32, i32
  }
  func.func @transform_3(%arg0: i32) -> (i32, i32, i32) {
    %c0_i32 = arith.constant 0 : i32
    %c0_i32_0 = arith.constant 0 : i32
    %c0_i32_1 = arith.constant 0 : i32
    return %arg0, %c0_i32, %c0_i32_0 : i32, i32, i32
  }
  func.func @transform_4(%arg0: i32) -> (i32, i32, i32) {
    %c0_i32 = arith.constant 0 : i32
    %c0_i32_0 = arith.constant 0 : i32
    %c0_i32_1 = arith.constant 0 : i32
    return %arg0, %c0_i32, %c0_i32_0 : i32, i32, i32
  }
}

module attributes {stable_mosaic.version = 11 : i64} {
  func.func @kernel(%arg0: i32, %arg1: i32, %arg2: i32, %arg3: memref<16x32xbf16, #tpu.memory_space<vmem>>, %arg4: memref<32x64xbf16, #tpu.memory_space<vmem>>, %arg5: memref<16x64xf32, #tpu.memory_space<vmem>>, %arg6: memref<16x64xf32, #tpu.memory_space<vmem>>) attributes {dimension_semantics = [#tpu.dimension_semantics<parallel>, #tpu.dimension_semantics<parallel>, #tpu.dimension_semantics<arbitrary>], iteration_bounds = array<i64: 1, 1, 1>, scalar_prefetch = 0 : i64, scratch_operands = 1 : i64, tpu.core_type = #tpu.core_type<tc>, window_params = [{transform_indices = @transform_0, window_bounds = array<i64: 16, 32>}, {transform_indices = @transform_1, window_bounds = array<i64: 32, 64>}, {transform_indices = @transform_2, window_bounds = array<i64: 16, 64>}]} {
    %c0_i32 = arith.constant 0 : i32
    %0 = arith.cmpi eq, %arg2, %c0_i32 : i32
    %1 = arith.extui %0 : i1 to i32
    %c0_i32_0 = arith.constant 0 : i32
    %2 = arith.cmpi ne, %1, %c0_i32_0 : i32
    scf.if %2 {
      %cst_10 = arith.constant 0.000000e+00 : f32
      %12 = vector.broadcast %cst_10 : f32 to vector<16x64xf32>
      %c0_11 = arith.constant 0 : index
      %c0_12 = arith.constant 0 : index
      %13 = vector.load %arg6[%c0_11, %c0_12] : memref<16x64xf32, #tpu.memory_space<vmem>>, vector<16x64xf32>
      tpu.vector_store %arg6[%c0_11, %c0_12], %12 {strides = array<i32>} : memref<16x64xf32, #tpu.memory_space<vmem>>, vector<16x64xf32>,
    } else {
    }
    %c0 = arith.constant 0 : index
    %c0_1 = arith.constant 0 : index
    %3 = vector.load %arg6[%c0, %c0_1] : memref<16x64xf32, #tpu.memory_space<vmem>>, vector<16x64xf32>
    %c0_2 = arith.constant 0 : index
    %c0_3 = arith.constant 0 : index
    %4 = vector.load %arg3[%c0_2, %c0_3] : memref<16x32xbf16, #tpu.memory_space<vmem>>, vector<16x32xbf16>
    %c0_4 = arith.constant 0 : index
    %c0_5 = arith.constant 0 : index
    %5 = vector.load %arg4[%c0_4, %c0_5] : memref<32x64xbf16, #tpu.memory_space<vmem>>, vector<32x64xbf16>
    %cst = arith.constant dense<0.000000e+00> : vector<16x64xf32>
    %6 = tpu.matmul %4, %5, %cst {dimension_numbers = #tpu.dot_dimension_numbers<[1], [0], [0], [1], [0, 0, 1, 1], [], []>} : vector<16x32xbf16>, vector<32x64xbf16>, vector<16x64xf32> -> vector<16x64xf32>
    %7 = arith.addf %3, %6 : vector<16x64xf32>
    %c0_6 = arith.constant 0 : index
    %c0_7 = arith.constant 0 : index
    %8 = vector.load %arg6[%c0_6, %c0_7] : memref<16x64xf32, #tpu.memory_space<vmem>>, vector<16x64xf32>
    tpu.vector_store %arg6[%c0_6, %c0_7], %7 {strides = array<i32>} : memref<16x64xf32, #tpu.memory_space<vmem>>, vector<16x64xf32>,
    %c0_i32_8 = arith.constant 0 : i32
    %9 = arith.cmpi eq, %arg2, %c0_i32_8 : i32
    %10 = arith.extui %9 : i1 to i32
    %c0_i32_9 = arith.constant 0 : i32
    %11 = arith.cmpi ne, %10, %c0_i32_9 : i32
    scf.if %11 {
      %c0_10 = arith.constant 0 : index
      %c0_11 = arith.constant 0 : index
      %12 = vector.load %arg6[%c0_10, %c0_11] : memref<16x64xf32, #tpu.memory_space<vmem>>, vector<16x64xf32>
      %c0_12 = arith.constant 0 : index
      %c0_13 = arith.constant 0 : index
      %13 = vector.load %arg5[%c0_12, %c0_13] : memref<16x64xf32, #tpu.memory_space<vmem>>, vector<16x64xf32>
      tpu.vector_store %arg5[%c0_12, %c0_13], %12 {strides = array<i32>} : memref<16x64xf32, #tpu.memory_space<vmem>>, vector<16x64xf32>,
    } else {
    }
    return
  }
  func.func @transform_0(%arg0: i32, %arg1: i32, %arg2: i32) -> (i32, i32) {
    %c0_i32 = arith.constant 0 : i32
    return %arg0, %arg2 : i32, i32
  }
  func.func @transform_1(%arg0: i32, %arg1: i32, %arg2: i32) -> (i32, i32) {
    %c0_i32 = arith.constant 0 : i32
    return %arg2, %arg1 : i32, i32
  }
  func.func @transform_2(%arg0: i32, %arg1: i32, %arg2: i32) -> (i32, i32) {
    %c0_i32 = arith.constant 0 : i32
    return %arg0, %arg1 : i32, i32
  }
}

</mosaic_0001>

<bundles_post_ra>
// kernel: _lambda_.41
= control target key start
LH: loop header
LB: loop body
LE: loop exit
PB: predicated region body
PF: predicated region fallthrough
CT: control target
= control target key end

     0   :  { %vm18_vm0 = vcmask 261120   ;;  %vm72_vm1 = vcmask 257024   ;;  %s132_s0 = inlined_call_operand.vmem [shape: bf16[16,32], index: 0, kind: input, shape index: {}]   ;;  %s133_s1 = inlined_call_operand.vmem [shape: f32[1,32], index: 1, kind: input, shape index: {}]   ;;  %s134_s2 = inlined_call_operand.vmem [shape: f32[1,32], index: 2, kind: input, shape index: {}]   ;;  %s135_s3 = inlined_call_operand.vmem [shape: bf16[16,32], index: 3, kind: output, shape index: {}]  }
   0x1   :  { %v86_v0 = vld [vmem:[%s132_s0] sm:$0xff]  }
   0x2   :  { %v87_v1 = vunpack.c.l.bf16 %v86_v0  ;;  %v88_v2 = vunpack.c.h.bf16 %v86_v0  ;;  %v79_v22 = vld [vmem:[%s133_s1] ss:$0 sm:$0xff] }
   0x3   :  { %v80_v24 = vld [vmem:[%s134_s2] ss:$0 sm:$0xff] }
   0x4   :  { %v19_v3 = vsel %vm18_vm0, %v87_v1, 0.0  ;;  %v22_v4 = vsel %vm18_vm0, %v88_v2, 0.0 }
   0x5   :  { %20 = vadd.xlane.f32.xlu0 %v19_v3 }
   0x9   :  { %23 = vadd.xlane.f32.xlu0 %v22_v4 }
  0x92   :  { %v21_v5 = vpop.xlane.xlu0 %20 }
  0x93   :  { %v26_v6 = vmul.f32 0.03125, %v21_v5 }
  0x95   :  { %v28_v7 = vsub.f32 %v87_v1, %v26_v6 }
  0x96   :  { %v24_v8 = vpop.xlane.xlu0 %23 }
  0x97   :  { %v27_v9 = vmul.f32 0.03125, %v24_v8  ;;  %v30_v10 = vmul.f32 %v28_v7, %v28_v7 }
  0x99   :  { %v29_v11 = vsub.f32 %v88_v2, %v27_v9  ;;  %v32_v12 = vsel %vm18_vm0, %v30_v10, 0.0 }
  0x9a   :  { %33 = vadd.xlane.f32.xlu1 %v32_v12 }
  0x9b   :  { %v31_v13 = vmul.f32 %v29_v11, %v29_v11 }
  0x9d   :  { %v35_v14 = vsel %vm18_vm0, %v31_v13, 0.0 }
  0x9e   :  { %36 = vadd.xlane.f32.xlu1 %v35_v14 }
 0x127   :  { %v34_v15 = vpop.xlane.xlu1 %33 }
 0x128   :  { %v38_v16 = vmul.f32 0.03125, %v34_v15 }
 0x12a   :  { %v40_v17 = vadd.f32 1e-05, %v38_v16 }
 0x12b   :  { %v37_v18 = vpop.xlane.xlu1 %36 }
 0x12c   :  { %89 = vrsqrt.f32 %v40_v17  ;;  %v39_v19 = vmul.f32 0.03125, %v37_v18 }
 0x12e   :  { %v41_v20 = vadd.f32 1e-05, %v39_v19 }
 0x130   :  { %91 = vrsqrt.f32 %v41_v20 }
 0x136   :  { %v90_v21 = vpop.eup %89 }
 0x137   :  { %v44_v23 = vmul.f32 %v90_v21, %v28_v7 }
 0x139   :  { %v53_v25 = vmul.f32 %v79_v22, %v44_v23 }
 0x13a   :  { %v92_v26 = vpop.eup %91 }
 0x13b   :  { %v62_v27 = vadd.f32 %v80_v24, %v53_v25  ;;  %v45_v28 = vmul.f32 %v92_v26, %v29_v11 }
 0x13d   :  { %v83_v29 = vpack.c.bf16 %v62_v27, %v62_v27  ;;  %v54_v30 = vmul.f32 %v79_v22, %v45_v28 }
 0x13f   :  { %73 = vst.msk [vmem:[%s135_s3] sm:$0xf] %vm72_vm1, %v83_v29  ;;  %v63_v31 = vadd.f32 %v80_v24, %v54_v30 }
 0x141   :  { %v84_v32 = vpack.c.bf16 %v63_v31, %v63_v31 }
 0x143   :  { %74 = vst.msk [vmem:[%s135_s3 + $0x4] sm:$0xf] %vm72_vm1, %v84_v32 }

// kernel: _lambda_.42
= control target key start
LH: loop header
LB: loop body
LE: loop exit
PB: predicated region body
PF: predicated region fallthrough
CT: control target
= control target key end

     0   :  { %vm19_vm0 = vcmask 785408   ;;  %v149_v0 = vmov 0.0   ;;  %vm150_vm1 = vmmov 0   ;;  %vm47_vm2 = vcmask 261120   ;;  %s193_s1 = inlined_call_operand.vmem [shape: bf16[32,96], index: 1, kind: input, shape index: {}]   ;;  %s194_s0 = inlined_call_operand.vmem [shape: bf16[16,32], index: 0, kind: input, shape index: {}]   ;;  %s195_s2 = inlined_call_operand.vmem [shape: bf16[1,96], index: 2, kind: input, shape index: {}]   ;;  %s196_s3 = inlined_call_operand.vmem [shape: bf16[16,96], index: 3, kind: output, shape index: {}]  }
   0x1   :  { %136 = vmatprep.subr.bf16.mxu0 %v149_v0  ;;  %v146_v1 = vld [vmem:[%s193_s1] sm:$0xff]   ;;  %140 = vmatprep.mubr.msk.bf16.mxu0 %vm150_vm1, %v149_v0  ;;  %20 = vst.msk [vmem:[#allocation2] sm:$0xff] %vm19_vm0, %v149_v0  ;;  %21 = vst.msk [vmem:[#allocation2 + $0x8] sm:$0xff] %vm19_vm0, %v149_v0  ;;  %v147_v2 = vld [vmem:[%s193_s1 + $0x8] sm:$0xff]   ;;  %v104_v4 = vlaneseq  ;;  %vm118_vm3 = vcmask 781312  }
   0x2   :  { %137 = vmatpush3.bf16.msra.mxu0 %v146_v1  ;;  %v148_v3 = vld [vmem:[%s194_s0] sm:$0xff]  }
   0x3   :  { %138 = vmatprep.subr.bf16.mxu0 %v149_v0  ;;  %v105_v6 = vshrl.u32 %v104_v4, 7  ;;  %v102_v8 = vld [vmem:[%s195_s2] sm:$0x1] }
   0x4   :  { %v103_v13 = vunpack.c.l.bf16 %v102_v8 }
   0x5   :  { %v106_v14 = vsub.s32 0, %v105_v6 }
   0x6   :  { %139 = vmatpush3.bf16.msra.mxu0 %v147_v2 }
   0x7   :  { %v107_v17 = vrot.slane %v103_v13, %v106_v14 }
   0x8   :  { %v22_v5 = vld [vmem:[#allocation2] sm:$0xff]  ;;  %v23_v9 = vld [vmem:[#allocation2 + $0x8] sm:$0xff] }
   0x9   :  { %141 = vmatmul.mubr.msk.bf16.vlgmr.msra.gmra.mrb[0].mxu0 %vm47_vm2, %v148_v3 }
  0xdc   :  { %v85_v7 = vpop.f32.mrb[0].mxu0 }
  0xdd   :  { %v92_v10 = vadd.f32 %v85_v7, %v22_v5  ;;  %v142_v11 = vpop.f32.mrb[1].mxu0 }
  0xde   :  { %v88_v12 = vpop.f32.mrb[2].mxu0 }
  0xdf   :  { %95 = vst.msk [vmem:[#allocation2] sm:$0xff] %vm19_vm0, %v92_v10  ;;  %v93_v15 = vadd.f32 %v88_v12, %v23_v9  ;;  %v143_v16 = vpop.f32.mrb[3].mxu0 }
  0xe1   :  { %96 = vst.msk [vmem:[#allocation2 + $0x8] sm:$0xff] %vm19_vm0, %v93_v15 }
  0xe6   :  { %v100_v18 = vld [vmem:[#allocation2] sm:$0xff] }
  0xe7   :  { %v108_v19 = vadd.f32 %v107_v17, %v100_v18 }
  0xe8   :  { %v101_v20 = vld [vmem:[#allocation2 + $0x8] sm:$0xff] }
  0xe9   :  { %v131_v21 = vpack.c.bf16 %v108_v19, %v108_v19  ;;  %v109_v22 = vadd.f32 %v107_v17, %v101_v20 }
  0xeb   :  { %119 = vst.msk [vmem:[%s196_s3] sm:$0xf] %vm118_vm3, %v131_v21  ;;  %v132_v23 = vpack.c.bf16 %v109_v22, %v109_v22 }
  0xed   :  { %120 = vst.msk [vmem:[%s196_s3 + $0x4] sm:$0xf] %vm118_vm3, %v132_v23 }

// kernel: _lambda_.43
= control target key start
LH: loop header
LB: loop body
LE: loop exit
PB: predicated region body
PF: predicated region fallthrough
CT: control target
= control target key end

     0   :  { %s975_s15 = smov 0   ;;  %s1079_s0 = inlined_call_operand.vmem [shape: bf16[2,8,32], index: 0, kind: input, shape index: {}]   ;;  %s1080_s1 = inlined_call_operand.vmem [shape: bf16[2,8,32], index: 1, kind: input, shape index: {}]   ;;  %s1081_s2 = inlined_call_operand.vmem [shape: bf16[2,8,32], index: 2, kind: input, shape index: {}]   ;;  %s1082_s3 = inlined_call_operand.vmem [shape: f32[2,1,8], index: 3, kind: input, shape index: {}]   ;;  %s1083_s4 = inlined_call_operand.vmem [shape: bf16[2,8,32], index: 4, kind: output, shape index: {}]  }
   0x1 LB: > { %s813_s16 = sadd.s32 4294967295, %s940_s15   ;;  %p817_p0 = scmp.ge.s32.totalorder %s940_s15, 1  ;;  %s940_s15 = sphi %s975_s15, %s14_s15  }
   0x2   : > { %p187_p1 = scmp.lt.s32.totalorder %s940_s15, 3 }
   0x4   : > { %p188_p2 = pnand %p817_p0, %p187_p1 }
   0x5   : > { %p222_p3 = scmp.lt.s32.totalorder (!%p188_p2), %s813_s16, 1  ;;  %v942_v0 = vmov (!%p188_p2), 0.0   ;;  %vm943_vm0 = vmmov (!%p188_p2), 0   ;;  %vm248_vm1 = vcmask (!%p188_p2), 64512   ;;  %v297_v4 = vlaneseq (!%p188_p2)  ;;  %s944_s27 = smov (!%p188_p2), 120  }
   0x6   : > { %191 = sbr.rel (%p188_p2) target bundleno = 1481 (0x5c9), region = 36  ;;  %851 = vmatprep.subr.bf16.mxu0 (!%p188_p2), %v942_v0  ;;  %853 = vmatprep.mubr.msk.bf16.mxu0 (!%p188_p2), %vm943_vm0, %v942_v0  ;;  %s945_s28 = smov (!%p188_p2), 112   ;;  %vm318_vm2 = vcmask (!%p188_p2), 1043456   ;;  %vm720_vm3 = vcmask (!%p188_p2), 130048   ;;  %vm722_vm4 = vcmask (!%p188_p2), 195584   ;;  %vm725_vm5 = vcmask (!%p188_p2), 257024  }
   0x7   : > { %857 = vmatprep.subr.bf16.mxu1 (!%p188_p2), %v942_v0  ;;  %859 = vmatprep.mubr.msk.bf16.mxu1 (!%p188_p2), %vm943_vm0, %v942_v0  ;;  %v298_v7 = vshrl.u32 (!%p188_p2), %v297_v4, 7  ;;  %s946_s29 = smov (!%p188_p2), 104   ;;  %s947_s7 = smov (!%p188_p2), 8  }
   0x8   : > { %s948_s8 = smov (!%p188_p2), 16   ;;  %s949_s9 = smov (!%p188_p2), 24  }
   0x9   : > { %v299_v9 = vsub.s32 (!%p188_p2), 0, %v298_v7 }
   0xd   : > { %s1085_s16 = smov (!%p222_p3, %s813_s16), 1 }
   0xe   : > { %s989_s17 = sshll.u32 %s1085_s16, 2  ;;  %s236_s26 = scalar_lea.vmem %s1082_s3, %s1085_s16 }
   0xf   : > { %s229_s20 = scalar_lea.vmem %s1080_s1, %s989_s17  ;;  %s225_s23 = scalar_lea.vmem %s1079_s0, %s989_s17  ;;  %v245_v5 = vld [vmem:[%s236_s26] sm:$0x1] }
  0x10   : > { %v243_v1 = vld [vmem:[%s229_s20] sm:$0xf]  ;;  %v246_v6 = vsub.f32 1.0, %v245_v5  ;;  %s233_s6 = scalar_lea.vmem %s1081_s2, %s989_s17  ;;  %s240_s12 = scalar_lea.vmem %s1083_s4, %s989_s17 }
  0x11   : > { %v253_v2 = vsel %vm248_vm1, %v243_v1, 0  ;;  %v242_v3 = vld [vmem:[%s225_s23] sm:$0xf]  ;;  %v825_v18 = vcombine.low %v243_v1, %v243_v1 }
  0x12   : > { %852 = vmatpush3.bf16.xpose.msra.mxu0 %v253_v2  ;;  %v247_v8 = vmul.f32 -1e+09, %v246_v6  ;;  %v824_v19 = vcombine.low %v242_v3, %v242_v3  ;;  %v1021_v25 = vld [vmem:[%s233_s6] sm:$0xf] }
  0x13   : > { %869 = vmatprep.subr.bf16.mxu0 %v942_v0  ;;  %370 = vrot.lane.b32.xlu1 %v825_v18, %s944_s27  ;;  %v320_v26 = vsel %vm318_vm2, %v1021_v25, 0 }
  0x14   : > { %v1007_v10 = vrot.slane %v247_v8, %v299_v9  ;;  %858 = vmatpush3.bf16.msra.mxu1 %v320_v26 }
  0x15   : > { %863 = vmatprep.subr.bf16.mxu1 %v942_v0 }
  0x17   : > { %365 = vrot.lane.b32.xlu1 %v824_v19, %s944_s27 }
  0x19   : > { %854 = vmatmul.mubr.msk.bf16.vlgmr.msra.gmra.mrb[0].mxu0 %vm248_vm1, %v242_v3 }
  0x1a   : > { %871 = vmatprep.mubr.msk.bf16.mxu0 %vm943_vm0, %v942_v0 }
  0x1b   : > { %483 = vrot.lane.b32.xlu1 %v824_v19, %s945_s28 }
  0x1f   : > { %597 = vrot.lane.b32.xlu1 %v825_v18, %s946_s29 }
  0x23   : > { %595 = vrot.lane.b32.xlu1 %v824_v19, %s946_s29 }
  0x85   : > { %v371_v29 = vpop.permute.xlu1 %370 }
  0x86   : > { %v376_v31 = vsel %vm248_vm1, %v371_v29, 0 }
  0x89   : > { %v366_v33 = vpop.permute.xlu1 %365 }
  0x8d   : > { %v484_v35 = vpop.permute.xlu1 %483 }
  0x91   : > { %v598_v37 = vpop.permute.xlu1 %597 }
  0x92   : > { %v603_v38 = vsel %vm248_vm1, %v598_v37, 0 }
  0x95   : > { %v596_v39 = vpop.permute.xlu1 %595 }
  0xec   : > { %v289_v11 = vpop.f32.mrb[0].mxu0 }
  0xed   : > { %v295_v12 = vmul.f32 0.35355338, %v289_v11  ;;  %v855_v13 = vpop.f32.mrb[1].mxu0 }
  0xee   : > { %v292_v14 = vpop.f32.mrb[2].mxu0 }
  0xef   : > { %v856_v15 = vpop.f32.mrb[3].mxu0  ;;  %v302_v16 = vadd.f32 %v1007_v10, %v295_v12 }
  0xf1   : > { %v303_v17 = vsel %vm248_vm1, %v302_v16, -inf }
  0xf2   : > { %304 = vmax.xlane.f32.xlu0 %v303_v17 }
 0x17f   : > { %v305_v20 = vpop.xlane.xlu0 %304 }
 0x180   : > { %v306_v21 = vsub.f32 %v302_v16, %v305_v20 }
 0x182   : > { %v307_v22 = vmul.f32 1.442695, %v306_v21 }
 0x184   : > { %918 = vpow2.f32 %v307_v22 }
 0x18e   : > { %v919_v23 = vpop.eup %918 }
 0x18f   : > { %v309_v24 = vsel %vm248_vm1, %v919_v23, 0.0 }
 0x190   : > { %310 = vadd.xlane.f32.xlu0 %v309_v24 }
 0x1a6   : > { %485 = vrot.lane.b32.xlu0 %v825_v18, %s945_s28 }
 0x21d   : > { %v311_v27 = vpop.xlane.xlu0 %310 }
 0x21e   : > { %920 = vrcp.f32 %v311_v27 }
 0x221   : > { %v486_v34 = vpop.permute.xlu0 %485 }
 0x222   : > { %v491_v36 = vsel %vm248_vm1, %v486_v34, 0 }
 0x228   : > { %v921_v28 = vpop.eup %920 }
 0x229   : > { %v313_v30 = vmul.f32 %v921_v28, %v919_v23 }
 0x22b   : > { %v314_v32 = vpack.c.bf16 %v313_v30, %v313_v30 }
 0x22d   : > { %860 = vmatmul.mubr.msk.bf16.vlgmr.msra.gmra.mrb[0].mxu1 %vm248_vm1, %v314_v32 }
 0x22e   : > { %864 = vmatpush3.bf16.xpose.msra.mxu1 %v376_v31  ;;  %865 = vmatprep.mubr.msk.bf16.mxu1 %vm943_vm0, %v942_v0 }
 0x22f   : > { %875 = vmatprep.subr.bf16.mxu1 %v942_v0 }
 0x235   : > { %866 = vmatmul.mubr.msk.bf16.vlgmr.msra.gmra.mrb[4].mxu1 %vm248_vm1, %v366_v33 }
 0x236   : > { %876 = vmatpush3.bf16.xpose.msra.mxu1 %v491_v36  ;;  %877 = vmatprep.mubr.msk.bf16.mxu1 %vm943_vm0, %v942_v0 }
 0x237   : > { %887 = vmatprep.subr.bf16.mxu1 %v942_v0 }
 0x23d   : > { %878 = vmatmul.mubr.msk.bf16.vlgmr.msra.gmra.mrb[8].mxu1 %vm248_vm1, %v484_v35 }
 0x23e   : > { %888 = vmatpush3.bf16.xpose.msra.mxu1 %v603_v38  ;;  %889 = vmatprep.mubr.msk.bf16.mxu1 %vm943_vm0, %v942_v0 }
 0x245   : > { %890 = vmatmul.mubr.msk.bf16.vlgmr.msra.gmra.mrb[12].mxu1 %vm248_vm1, %v596_v39 }
 0x300   : > { %v1042_v40 = vpop.f32.mrb[0].mxu1 }
 0x301   : > { %v861_v41 = vpop.f32.mrb[1].mxu1 }
 0x302   : > { %v359_v42 = vpop.f32.mrb[2].mxu1 }
 0x303   : > { %v862_v43 = vpop.f32.mrb[3].mxu1 }
 0x308   : > { %v412_v44 = vpop.f32.mrb[4].mxu1 }
 0x309   : > { %v418_v45 = vmul.f32 0.35355338, %v412_v44  ;;  %v867_v46 = vpop.f32.mrb[5].mxu1 }
 0x30a   : > { %v415_v47 = vpop.f32.mrb[6].mxu1 }
 0x30b   : > { %v868_v48 = vpop.f32.mrb[7].mxu1  ;;  %v419_v49 = vadd.f32 %v418_v45, %v1007_v10 }
 0x30d   : > { %v420_v50 = vsel %vm248_vm1, %v419_v49, -inf }
 0x30e   : > { %421 = vmax.xlane.f32.xlu1 %v420_v50 }
 0x310   : > { %v527_v51 = vpop.f32.mrb[8].mxu1 }
 0x311   : > { %v533_v52 = vmul.f32 0.35355338, %v527_v51  ;;  %v879_v53 = vpop.f32.mrb[9].mxu1 }
 0x312   : > { %v530_v54 = vpop.f32.mrb[10].mxu1 }
 0x313   : > { %v534_v55 = vadd.f32 %v533_v52, %v1007_v10  ;;  %v880_v56 = vpop.f32.mrb[11].mxu1 }
 0x315   : > { %v535_v57 = vsel %vm248_vm1, %v534_v55, -inf }
 0x316   : > { %536 = vmax.xlane.f32.xlu0 %v535_v57 }
 0x318   : > { %v639_v58 = vpop.f32.mrb[12].mxu1 }
 0x319   : > { %v645_v59 = vmul.f32 0.35355338, %v639_v58  ;;  %v891_v60 = vpop.f32.mrb[13].mxu1 }
 0x31a   : > { %v642_v61 = vpop.f32.mrb[14].mxu1 }
 0x31b   : > { %v646_v62 = vadd.f32 %v645_v59, %v1007_v10  ;;  %v892_v63 = vpop.f32.mrb[15].mxu1  ;;  %v827_v10 = vcombine.low %v1021_v25, %v1021_v25 }
 0x31d   : > { %v647_v1 = vsel %vm248_vm1, %v646_v62, -inf }
 0x31e   : > { %648 = vmax.xlane.f32.xlu1 %v647_v1 }
 0x39b   : > { %v422_v2 = vpop.xlane.xlu1 %421 }
 0x39c   : > { %v423_v3 = vsub.f32 %v419_v49, %v422_v2 }
 0x39e   : > { %v424_v4 = vmul.f32 1.442695, %v423_v3 }
 0x3a0   : > { %922 = vpow2.f32 %v424_v4 }
 0x3a3   : > { %v537_v5 = vpop.xlane.xlu0 %536 }
 0x3a4   : > { %v538_v6 = vsub.f32 %v534_v55, %v537_v5 }
 0x3a6   : > { %v539_v7 = vmul.f32 1.442695, %v538_v6 }
 0x3a8   : > { %924 = vpow2.f32 %v539_v7 }
 0x3aa   : > { %v923_v8 = vpop.eup %922 }
 0x3ab   : > { %v426_v9 = vsel %vm248_vm1, %v923_v8, 0.0  ;;  %v649_v13 = vpop.xlane.xlu1 %648 }
 0x3ac   : > { %427 = vadd.xlane.f32.xlu1 %v426_v9  ;;  %v650_v14 = vsub.f32 %v646_v62, %v649_v13 }
 0x3ae   : > { %v651_v15 = vmul.f32 1.442695, %v650_v14 }
 0x3b0   : > { %926 = vpow2.f32 %v651_v15 }
 0x3b2   : > { %v925_v11 = vpop.eup %924 }
 0x3b3   : > { %v541_v12 = vsel %vm248_vm1, %v925_v11, 0.0 }
 0x3b4   : > { %542 = vadd.xlane.f32.xlu0 %v541_v12 }
 0x3ba   : > { %v927_v16 = vpop.eup %926 }
 0x3bb   : > { %v653_v17 = vsel %vm248_vm1, %v927_v16, 0.0 }
 0x3bd   : > { %547 = vrot.lane.b32.xlu1 %v827_v10, %s945_s28 }
 0x3ca   : > { %435 = vrot.lane.b32.xlu0 %v827_v10, %s944_s27 }
 0x3e1   : > { %654 = vadd.xlane.f32.xlu1 %v653_v17 }
 0x3f2   : > { %659 = vrot.lane.b32.xlu1 %v827_v10, %s946_s29 }
 0x439   : > { %v428_v18 = vpop.xlane.xlu1 %427 }
 0x43a   : > { %928 = vrcp.f32 %v428_v18 }
 0x43d   : > { %v548_v24 = vpop.permute.xlu1 %547 }
 0x43e   : > { %v553_v26 = vsel %vm318_vm2, %v548_v24, 0 }
 0x441   : > { %v543_v19 = vpop.xlane.xlu0 %542 }
 0x442   : > { %930 = vrcp.f32 %v543_v19 }
 0x444   : > { %v929_v20 = vpop.eup %928 }
 0x445   : > { %v430_v21 = vmul.f32 %v929_v20, %v923_v8  ;;  %v436_v22 = vpop.permute.xlu0 %435 }
 0x446   : > { %v441_v23 = vsel %vm318_vm2, %v436_v22, 0 }
 0x447   : > { %870 = vmatpush3.bf16.msra.mxu0 %v441_v23  ;;  %v431_v25 = vpack.c.bf16 %v430_v21, %v430_v21 }
 0x448   : > { %881 = vmatprep.subr.bf16.mxu0 %v942_v0 }
 0x44a   : > { %872 = vmatmul.mubr.msk.bf16.vlgmr.msra.gmra.mrb[4].mxu0 %vm248_vm1, %v431_v25 }
 0x44b   : > { %882 = vmatpush3.bf16.msra.mxu0 %v553_v26  ;;  %883 = vmatprep.mubr.msk.bf16.mxu0 %vm943_vm0, %v942_v0 }
 0x44c   : > { %v931_v27 = vpop.eup %930  ;;  %893 = vmatprep.subr.bf16.mxu0 %v942_v0 }
 0x44d   : > { %v545_v28 = vmul.f32 %v931_v27, %v925_v11 }
 0x44f   : > { %v546_v29 = vpack.c.bf16 %v545_v28, %v545_v28 }
 0x452   : > { %884 = vmatmul.mubr.msk.bf16.vlgmr.msra.gmra.mrb[8].mxu0 %vm248_vm1, %v546_v29 }
 0x453   : > { %895 = vmatprep.mubr.msk.bf16.mxu0 %vm943_vm0, %v942_v0 }
 0x46e   : > { %v655_v30 = vpop.xlane.xlu1 %654 }
 0x46f   : > { %932 = vrcp.f32 %v655_v30 }
 0x472   : > { %v660_v31 = vpop.permute.xlu1 %659 }
 0x473   : > { %v665_v32 = vsel %vm318_vm2, %v660_v31, 0 }
 0x474   : > { %894 = vmatpush3.bf16.msra.mxu0 %v665_v32 }
 0x479   : > { %v933_v33 = vpop.eup %932 }
 0x47a   : > { %v657_v34 = vmul.f32 %v933_v33, %v927_v16 }
 0x47c   : > { %v658_v35 = vpack.c.bf16 %v657_v34, %v657_v34 }
 0x47e   : > { %896 = vmatmul.mubr.msk.bf16.vlgmr.msra.gmra.mrb[12].mxu0 %vm248_vm1, %v658_v35 }
 0x51d   : > { %v477_v36 = vpop.f32.mrb[4].mxu0 }
 0x51e   : > { %708 = vrot.lane.b32.xlu0 %v477_v36, %s947_s7  ;;  %v873_v37 = vpop.f32.mrb[5].mxu0 }
 0x51f   : > { %v480_v38 = vpop.f32.mrb[6].mxu0 }
 0x520   : > { %v874_v39 = vpop.f32.mrb[7].mxu0 }
 0x525   : > { %v589_v41 = vpop.f32.mrb[8].mxu0 }
 0x526   : > { %712 = vrot.lane.b32.xlu1 %v589_v41, %s948_s8  ;;  %v885_v0 = vpop.f32.mrb[9].mxu0 }
 0x527   : > { %v592_v42 = vpop.f32.mrb[10].mxu0 }
 0x528   : > { %v886_v43 = vpop.f32.mrb[11].mxu0 }
 0x551   : > { %v701_v44 = vpop.f32.mrb[12].mxu0 }
 0x552   : > { %716 = vrot.lane.b32.xlu0 %v701_v44, %s949_s9  ;;  %v897_v45 = vpop.f32.mrb[13].mxu0 }
 0x553   : > { %v704_v46 = vpop.f32.mrb[14].mxu0 }
 0x554   : > { %v898_v47 = vpop.f32.mrb[15].mxu0 }
 0x590   : > { %v709_v48 = vpop.permute.xlu0 %708 }
 0x591   : > { %v719_v50 = vsel %vm248_vm1, %v1042_v40, %v709_v48 }
 0x598   : > { %v713_v49 = vpop.permute.xlu1 %712 }
 0x599   : > { %v721_v51 = vsel %vm720_vm3, %v719_v50, %v713_v49 }
 0x5c4   : > { %v717_v52 = vpop.permute.xlu0 %716 }
 0x5c5   : > { %v723_v53 = vsel %vm722_vm4, %v721_v51, %v717_v52 }
 0x5c6   : > { %v724_v54 = vpack.c.bf16 %v723_v53, %v723_v53 }
 0x5c8   : > { %726 = vst.msk [vmem:[%s240_s12] sm:$0xf] %vm725_vm5, %v724_v54 }
 0x5c9 PF: > { %s14_s15 = sadd.s32 1, %s940_s15  }
 0x5ca   : > { %p11_p4 = scmp.ge.s32.totalorder %s14_s15, 4  }
 0x5cc   :  { %13 = sbr.rel (!%p11_p4) target bundleno = 1 (0x1), region = 75 }

// kernel: _lambda_.44
= control target key start
LH: loop header
LB: loop body
LE: loop exit
PB: predicated region body
PF: predicated region fallthrough
CT: control target
= control target key end

     0   :  { %vm19_vm0 = vcmask 261120   ;;  %v148_v0 = vmov 0.0   ;;  %vm149_vm1 = vmmov 0   ;;  %v103_v4 = vlaneseq  ;;  %s193_s1 = inlined_call_operand.vmem [shape: bf16[32,32], index: 1, kind: input, shape index: {}]   ;;  %s194_s0 = inlined_call_operand.vmem [shape: bf16[16,32], index: 0, kind: input, shape index: {}]   ;;  %s195_s2 = inlined_call_operand.vmem [shape: bf16[1,32], index: 2, kind: input, shape index: {}]   ;;  %s196_s3 = inlined_call_operand.vmem [shape: bf16[16,32], index: 3, kind: output, shape index: {}]  }
   0x1   :  { %135 = vmatprep.subr.bf16.mxu0 %v148_v0  ;;  %v145_v1 = vld [vmem:[%s193_s1] sm:$0xff]   ;;  %139 = vmatprep.mubr.msk.bf16.mxu0 %vm149_vm1, %v148_v0  ;;  %20 = vst.msk [vmem:[#allocation2] sm:$0xff] %vm19_vm0, %v148_v0  ;;  %21 = vst.msk [vmem:[#allocation2 + $0x8] sm:$0xff] %vm19_vm0, %v148_v0  ;;  %v146_v2 = vld [vmem:[%s193_s1 + $0x8] sm:$0xff]   ;;  %vm117_vm2 = vcmask 257024  }
   0x2   :  { %136 = vmatpush3.bf16.msra.mxu0 %v145_v1  ;;  %v147_v3 = vld [vmem:[%s194_s0] sm:$0xff]   ;;  %v104_v6 = vshrl.u32 %v103_v4, 7 }
   0x3   :  { %137 = vmatprep.subr.bf16.mxu0 %v148_v0  ;;  %v101_v8 = vld [vmem:[%s195_s2] sm:$0x1] }
   0x4   :  { %v102_v13 = vunpack.c.l.bf16 %v101_v8  ;;  %v105_v14 = vsub.s32 0, %v104_v6 }
   0x6   :  { %138 = vmatpush3.bf16.msra.mxu0 %v146_v2  ;;  %v106_v17 = vrot.slane %v102_v13, %v105_v14 }
   0x8   :  { %v22_v5 = vld [vmem:[#allocation2] sm:$0xff]  ;;  %v23_v9 = vld [vmem:[#allocation2 + $0x8] sm:$0xff] }
   0x9   :  { %140 = vmatmul.mubr.msk.bf16.vlgmr.msra.gmra.mrb[0].mxu0 %vm19_vm0, %v147_v3 }
  0xdc   :  { %v85_v7 = vpop.f32.mrb[0].mxu0 }
  0xdd   :  { %v92_v10 = vadd.f32 %v85_v7, %v22_v5  ;;  %v141_v11 = vpop.f32.mrb[1].mxu0 }
  0xde   :  { %v88_v12 = vpop.f32.mrb[2].mxu0 }
  0xdf   :  { %94 = vst.msk [vmem:[#allocation2] sm:$0xff] %vm19_vm0, %v92_v10  ;;  %v93_v15 = vadd.f32 %v88_v12, %v23_v9  ;;  %v142_v16 = vpop.f32.mrb[3].mxu0 }
  0xe1   :  { %95 = vst.msk [vmem:[#allocation2 + $0x8] sm:$0xff] %vm19_vm0, %v93_v15 }
  0xe6   :  { %v99_v18 = vld [vmem:[#allocation2] sm:$0xff] }
  0xe7   :  { %v107_v19 = vadd.f32 %v106_v17, %v99_v18 }
  0xe8   :  { %v100_v20 = vld [vmem:[#allocation2 + $0x8] sm:$0xff] }
  0xe9   :  { %v130_v21 = vpack.c.bf16 %v107_v19, %v107_v19  ;;  %v108_v22 = vadd.f32 %v106_v17, %v100_v20 }
  0xeb   :  { %118 = vst.msk [vmem:[%s196_s3] sm:$0xf] %vm117_vm2, %v130_v21  ;;  %v131_v23 = vpack.c.bf16 %v108_v22, %v108_v22 }
  0xed   :  { %119 = vst.msk [vmem:[%s196_s3 + $0x4] sm:$0xf] %vm117_vm2, %v131_v23 }

// kernel: _lambda_.45
= control target key start
LH: loop header
LB: loop body
LE: loop exit
PB: predicated region body
PF: predicated region fallthrough
CT: control target
= control target key end

     0   :  { %vm27_vm0 = vcmask 261120   ;;  %vm81_vm1 = vcmask 257024   ;;  %s153_s0 = inlined_call_operand.vmem [shape: bf16[16,32], index: 0, kind: input, shape index: {}]   ;;  %s154_s1 = inlined_call_operand.vmem [shape: bf16[16,32], index: 1, kind: input, shape index: {}]   ;;  %s155_s2 = inlined_call_operand.vmem [shape: f32[1,32], index: 2, kind: input, shape index: {}]   ;;  %s156_s3 = inlined_call_operand.vmem [shape: f32[1,32], index: 3, kind: input, shape index: {}]   ;;  %s157_s4 = inlined_call_operand.vmem [shape: bf16[16,32], index: 4, kind: output, shape index: {}]  }
   0x1   :  { %v95_v0 = vld [vmem:[%s153_s0] sm:$0xff]  }
   0x2   :  { %v99_v1 = vld [vmem:[%s154_s1] sm:$0xff]   ;;  %v96_v2 = vunpack.c.l.bf16 %v95_v0  ;;  %v97_v4 = vunpack.c.h.bf16 %v95_v0 }
   0x3   :  { %v100_v3 = vunpack.c.l.bf16 %v99_v1  ;;  %v101_v5 = vunpack.c.h.bf16 %v99_v1  ;;  %v88_v27 = vld [vmem:[%s155_s2] ss:$0 sm:$0xff] }
   0x4   :  { %v89_v29 = vld [vmem:[%s156_s3] ss:$0 sm:$0xff] }
   0x5   :  { %v25_v6 = vadd.f32 %v100_v3, %v96_v2  ;;  %v26_v7 = vadd.f32 %v101_v5, %v97_v4 }
   0x7   :  { %v28_v8 = vsel %vm27_vm0, %v25_v6, 0.0  ;;  %v31_v9 = vsel %vm27_vm0, %v26_v7, 0.0 }
   0x8   :  { %29 = vadd.xlane.f32.xlu0 %v28_v8 }
   0xc   :  { %32 = vadd.xlane.f32.xlu0 %v31_v9 }
  0x95   :  { %v30_v10 = vpop.xlane.xlu0 %29 }
  0x96   :  { %v35_v11 = vmul.f32 0.03125, %v30_v10 }
  0x98   :  { %v37_v12 = vsub.f32 %v25_v6, %v35_v11 }
  0x99   :  { %v33_v13 = vpop.xlane.xlu0 %32 }
  0x9a   :  { %v36_v14 = vmul.f32 0.03125, %v33_v13  ;;  %v39_v15 = vmul.f32 %v37_v12, %v37_v12 }
  0x9c   :  { %v38_v16 = vsub.f32 %v26_v7, %v36_v14  ;;  %v41_v17 = vsel %vm27_vm0, %v39_v15, 0.0 }
  0x9d   :  { %42 = vadd.xlane.f32.xlu1 %v41_v17 }
  0x9e   :  { %v40_v18 = vmul.f32 %v38_v16, %v38_v16 }
  0xa0   :  { %v44_v19 = vsel %vm27_vm0, %v40_v18, 0.0 }
  0xa1   :  { %45 = vadd.xlane.f32.xlu1 %v44_v19 }
 0x12a   :  { %v43_v20 = vpop.xlane.xlu1 %42 }
 0x12b   :  { %v47_v21 = vmul.f32 0.03125, %v43_v20 }
 0x12d   :  { %v49_v22 = vadd.f32 1e-05, %v47_v21 }
 0x12e   :  { %v46_v23 = vpop.xlane.xlu1 %45 }
 0x12f   :  { %102 = vrsqrt.f32 %v49_v22  ;;  %v48_v24 = vmul.f32 0.03125, %v46_v23 }
 0x131   :  { %v50_v25 = vadd.f32 1e-05, %v48_v24 }
 0x133   :  { %104 = vrsqrt.f32 %v50_v25 }
 0x139   :  { %v103_v26 = vpop.eup %102 }
 0x13a   :  { %v53_v28 = vmul.f32 %v103_v26, %v37_v12 }
 0x13c   :  { %v62_v30 = vmul.f32 %v88_v27, %v53_v28 }
 0x13d   :  { %v105_v31 = vpop.eup %104 }
 0x13e   :  { %v71_v32 = vadd.f32 %v89_v29, %v62_v30  ;;  %v54_v33 = vmul.f32 %v105_v31, %v38_v16 }
 0x140   :  { %v92_v34 = vpack.c.bf16 %v71_v32, %v71_v32  ;;  %v63_v35 = vmul.f32 %v88_v27, %v54_v33 }
 0x142   :  { %82 = vst.msk [vmem:[%s157_s4] sm:$0xf] %vm81_vm1, %v92_v34  ;;  %v72_v36 = vadd.f32 %v89_v29, %v63_v35 }
 0x144   :  { %v93_v37 = vpack.c.bf16 %v72_v36, %v72_v36 }
 0x146   :  { %83 = vst.msk [vmem:[%s157_s4 + $0x4] sm:$0xf] %vm81_vm1, %v93_v37 }

// kernel: _lambda_.46
= control target key start
LH: loop header
LB: loop body
LE: loop exit
PB: predicated region body
PF: predicated region fallthrough
CT: control target
= control target key end

     0   :  { %vm19_vm0 = vcmask 523264   ;;  %v171_v0 = vmov 0.0   ;;  %vm172_vm1 = vmmov 0   ;;  %vm47_vm2 = vcmask 261120   ;;  %s215_s1 = inlined_call_operand.vmem [shape: bf16[32,64], index: 1, kind: input, shape index: {}]   ;;  %s216_s0 = inlined_call_operand.vmem [shape: bf16[16,32], index: 0, kind: input, shape index: {}]   ;;  %s217_s2 = inlined_call_operand.vmem [shape: bf16[1,64], index: 2, kind: input, shape index: {}]   ;;  %s218_s3 = inlined_call_operand.vmem [shape: bf16[16,64], index: 3, kind: output, shape index: {}]  }
   0x1   :  { %154 = vmatprep.subr.bf16.mxu0 %v171_v0  ;;  %v164_v1 = vld [vmem:[%s215_s1] sm:$0xff]   ;;  %158 = vmatprep.mubr.msk.bf16.mxu0 %vm172_vm1, %v171_v0  ;;  %20 = vst.msk [vmem:[#allocation2] sm:$0xff] %vm19_vm0, %v171_v0  ;;  %21 = vst.msk [vmem:[#allocation2 + $0x8] sm:$0xff] %vm19_vm0, %v171_v0  ;;  %v165_v2 = vld [vmem:[%s215_s1 + $0x8] sm:$0xff]   ;;  %v104_v4 = vlaneseq  ;;  %vm136_vm3 = vcmask 519168  }
   0x2   :  { %155 = vmatpush3.bf16.msra.mxu0 %v164_v1  ;;  %v166_v3 = vld [vmem:[%s216_s0] sm:$0xff]  }
   0x3   :  { %156 = vmatprep.subr.bf16.mxu0 %v171_v0  ;;  %v105_v6 = vshrl.u32 %v104_v4, 7  ;;  %v102_v8 = vld [vmem:[%s217_s2] sm:$0x1] }
   0x4   :  { %v103_v13 = vunpack.c.l.bf16 %v102_v8 }
   0x5   :  { %v106_v14 = vsub.s32 0, %v105_v6 }
   0x6   :  { %157 = vmatpush3.bf16.msra.mxu0 %v165_v2 }
   0x7   :  { %v107_v17 = vrot.slane %v103_v13, %v106_v14 }
   0x8   :  { %v22_v5 = vld [vmem:[#allocation2] sm:$0xff]  ;;  %v23_v9 = vld [vmem:[#allocation2 + $0x8] sm:$0xff] }
   0x9   :  { %159 = vmatmul.mubr.msk.bf16.vlgmr.msra.gmra.mrb[0].mxu0 %vm47_vm2, %v166_v3 }
  0xdc   :  { %v85_v7 = vpop.f32.mrb[0].mxu0 }
  0xdd   :  { %v92_v10 = vadd.f32 %v85_v7, %v22_v5  ;;  %v160_v11 = vpop.f32.mrb[1].mxu0 }
  0xde   :  { %v88_v12 = vpop.f32.mrb[2].mxu0 }
  0xdf   :  { %95 = vst.msk [vmem:[#allocation2] sm:$0xff] %vm19_vm0, %v92_v10  ;;  %v93_v15 = vadd.f32 %v88_v12, %v23_v9  ;;  %v161_v16 = vpop.f32.mrb[3].mxu0 }
  0xe1   :  { %96 = vst.msk [vmem:[#allocation2 + $0x8] sm:$0xff] %vm19_vm0, %v93_v15 }
  0xe6   :  { %v100_v18 = vld [vmem:[#allocation2] sm:$0xff] }
  0xe7   :  { %v108_v19 = vadd.f32 %v107_v17, %v100_v18 }
  0xe8   :  { %v101_v20 = vld [vmem:[#allocation2 + $0x8] sm:$0xff] }
  0xe9   :  { %v110_v21 = vmul.f32 %v108_v19, %v108_v19  ;;  %v109_v22 = vadd.f32 %v107_v17, %v101_v20 }
  0xeb   :  { %v112_v23 = vmul.f32 %v110_v21, %v108_v19  ;;  %v111_v24 = vmul.f32 %v109_v22, %v109_v22 }
  0xed   :  { %v114_v25 = vmul.f32 0.044715, %v112_v23  ;;  %v113_v26 = vmul.f32 %v111_v24, %v109_v22 }
  0xef   :  { %v116_v27 = vadd.f32 %v114_v25, %v108_v19  ;;  %v115_v28 = vmul.f32 0.044715, %v113_v26 }
  0xf1   :  { %v118_v29 = vmul.f32 0.7978846, %v116_v27  ;;  %v117_v30 = vadd.f32 %v115_v28, %v109_v22 }
  0xf3   :  { %167 = vtanh.f32 %v118_v29  ;;  %v119_v31 = vmul.f32 0.7978846, %v117_v30 }
  0xf5   :  { %169 = vtanh.f32 %v119_v31 }
  0xfd   :  { %v168_v32 = vpop.eup %167 }
  0xfe   :  { %v122_v33 = vadd.f32 1.0, %v168_v32 }
  0xff   :  { %v170_v34 = vpop.eup %169 }
 0x100   :  { %v124_v35 = vmul.f32 0.5, %v122_v33  ;;  %v123_v36 = vadd.f32 1.0, %v170_v34 }
 0x102   :  { %v126_v37 = vmul.f32 %v124_v35, %v108_v19  ;;  %v125_v38 = vmul.f32 0.5, %v123_v36 }
 0x104   :  { %v149_v39 = vpack.c.bf16 %v126_v37, %v126_v37  ;;  %v127_v40 = vmul.f32 %v125_v38, %v109_v22 }
 0x106   :  { %137 = vst.msk [vmem:[%s218_s3] sm:$0xf] %vm136_vm3, %v149_v39  ;;  %v150_v41 = vpack.c.bf16 %v127_v40, %v127_v40 }
 0x108   :  { %138 = vst.msk [vmem:[%s218_s3 + $0x4] sm:$0xf] %vm136_vm3, %v150_v41 }

// kernel: _lambda_.47
= control target key start
LH: loop header
LB: loop body
LE: loop exit
PB: predicated region body
PF: predicated region fallthrough
CT: control target
= control target key end

     0   :  { %vm19_vm0 = vcmask 261120   ;;  %v175_v0 = vmov 0.0   ;;  %vm176_vm1 = vmmov 0   ;;  %vm63_vm2 = vcmask 523264   ;;  %s225_s1 = inlined_call_operand.vmem [shape: bf16[64,32], index: 1, kind: input, shape index: {}]   ;;  %s226_s0 = inlined_call_operand.vmem [shape: bf16[16,64], index: 0, kind: input, shape index: {}]   ;;  %s227_s2 = inlined_call_operand.vmem [shape: bf16[1,32], index: 2, kind: input, shape index: {}]   ;;  %s228_s3 = inlined_call_operand.vmem [shape: bf16[16,32], index: 3, kind: output, shape index: {}]  }
   0x1   :  { %156 = vmatprep.subr.bf16.mxu0 %v175_v0  ;;  %v170_v1 = vld [vmem:[%s225_s1] sm:$0xff]   ;;  %164 = vmatprep.mubr.msk.bf16.mxu0 %vm176_vm1, %v175_v0  ;;  %20 = vst.msk [vmem:[#allocation2] sm:$0xff] %vm19_vm0, %v175_v0  ;;  %21 = vst.msk [vmem:[#allocation2 + $0x8] sm:$0xff] %vm19_vm0, %v175_v0  ;;  %v171_v2 = vld [vmem:[%s225_s1 + $0x8] sm:$0xff]   ;;  %v120_v6 = vlaneseq  ;;  %vm134_vm3 = vcmask 257024  }
   0x2   :  { %157 = vmatpush3.bf16.msra.mxu0 %v170_v1  ;;  %v172_v3 = vld [vmem:[%s225_s1 + $0x10] sm:$0xff]   ;;  %v173_v4 = vld [vmem:[%s225_s1 + $0x18] sm:$0xff]   ;;  %v174_v5 = vld [vmem:[%s226_s0] sm:$0xff]  }
   0x3   :  { %158 = vmatprep.subr.bf16.mxu0 %v175_v0  ;;  %v121_v8 = vshrl.u32 %v120_v6, 7  ;;  %v118_v10 = vld [vmem:[%s227_s2] sm:$0x1] }
   0x4   :  { %v119_v15 = vunpack.c.l.bf16 %v118_v10 }
   0x5   :  { %v122_v16 = vsub.s32 0, %v121_v8 }
   0x6   :  { %159 = vmatpush3.bf16.msra.mxu0 %v171_v2 }
   0x7   :  { %160 = vmatprep.subr.bf16.mxu0 %v175_v0  ;;  %v123_v19 = vrot.slane %v119_v15, %v122_v16 }
   0x8   :  { %v22_v7 = vld [vmem:[#allocation2] sm:$0xff]  ;;  %v23_v11 = vld [vmem:[#allocation2 + $0x8] sm:$0xff] }
   0xa   :  { %161 = vmatpush3.bf16.msra.mxu0 %v172_v3 }
   0xb   :  { %162 = vmatprep.subr.bf16.mxu0 %v175_v0 }
   0xe   :  { %163 = vmatpush3.bf16.msra.mxu0 %v173_v4 }
  0x11   :  { %165 = vmatmul.mubr.msk.bf16.vlgmr.msra.gmra.mrb[0].mxu0 %vm63_vm2, %v174_v5 }
  0xe4   :  { %v101_v9 = vpop.f32.mrb[0].mxu0 }
  0xe5   :  { %v108_v12 = vadd.f32 %v101_v9, %v22_v7  ;;  %v166_v13 = vpop.f32.mrb[1].mxu0 }
  0xe6   :  { %v104_v14 = vpop.f32.mrb[2].mxu0 }
  0xe7   :  { %111 = vst.msk [vmem:[#allocation2] sm:$0xff] %vm19_vm0, %v108_v12  ;;  %v109_v17 = vadd.f32 %v104_v14, %v23_v11  ;;  %v167_v18 = vpop.f32.mrb[3].mxu0 }
  0xe9   :  { %112 = vst.msk [vmem:[#allocation2 + $0x8] sm:$0xff] %vm19_vm0, %v109_v17 }
  0xee   :  { %v116_v20 = vld [vmem:[#allocation2] sm:$0xff] }
  0xef   :  { %v124_v21 = vadd.f32 %v123_v19, %v116_v20 }
  0xf0   :  { %v117_v22 = vld [vmem:[#allocation2 + $0x8] sm:$0xff] }
  0xf1   :  { %v149_v23 = vpack.c.bf16 %v124_v21, %v124_v21  ;;  %v125_v24 = vadd.f32 %v123_v19, %v117_v22 }
  0xf3   :  { %135 = vst.msk [vmem:[%s228_s3] sm:$0xf] %vm134_vm3, %v149_v23  ;;  %v150_v25 = vpack.c.bf16 %v125_v24, %v125_v24 }
  0xf5   :  { %136 = vst.msk [vmem:[%s228_s3 + $0x4] sm:$0xf] %vm134_vm3, %v150_v25 }

// kernel: _lambda_.62
= control target key start
LH: loop header
LB: loop body
LE: loop exit
PB: predicated region body
PF: predicated region fallthrough
CT: control target
= control target key end

     0   :  { %vm19_vm0 = vcmask 523264   ;;  %v149_v0 = vmov 0.0   ;;  %vm150_vm1 = vmmov 0   ;;  %vm47_vm2 = vcmask 261120   ;;  %s193_s1 = inlined_call_operand.vmem [shape: bf16[32,64], index: 1, kind: input, shape index: {}]   ;;  %s194_s0 = inlined_call_operand.vmem [shape: bf16[16,32], index: 0, kind: input, shape index: {}]   ;;  %s195_s2 = inlined_call_operand.vmem [shape: bf16[1,64], index: 2, kind: input, shape index: {}]   ;;  %s196_s3 = inlined_call_operand.vmem [shape: bf16[16,64], index: 3, kind: output, shape index: {}]  }
   0x1   :  { %136 = vmatprep.subr.bf16.mxu0 %v149_v0  ;;  %v146_v1 = vld [vmem:[%s193_s1] sm:$0xff]   ;;  %140 = vmatprep.mubr.msk.bf16.mxu0 %vm150_vm1, %v149_v0  ;;  %20 = vst.msk [vmem:[#allocation2] sm:$0xff] %vm19_vm0, %v149_v0  ;;  %21 = vst.msk [vmem:[#allocation2 + $0x8] sm:$0xff] %vm19_vm0, %v149_v0  ;;  %v147_v2 = vld [vmem:[%s193_s1 + $0x8] sm:$0xff]   ;;  %v104_v4 = vlaneseq  ;;  %vm118_vm3 = vcmask 519168  }
   0x2   :  { %137 = vmatpush3.bf16.msra.mxu0 %v146_v1  ;;  %v148_v3 = vld [vmem:[%s194_s0] sm:$0xff]  }
   0x3   :  { %138 = vmatprep.subr.bf16.mxu0 %v149_v0  ;;  %v105_v6 = vshrl.u32 %v104_v4, 7  ;;  %v102_v8 = vld [vmem:[%s195_s2] sm:$0x1] }
   0x4   :  { %v103_v13 = vunpack.c.l.bf16 %v102_v8 }
   0x5   :  { %v106_v14 = vsub.s32 0, %v105_v6 }
   0x6   :  { %139 = vmatpush3.bf16.msra.mxu0 %v147_v2 }
   0x7   :  { %v107_v17 = vrot.slane %v103_v13, %v106_v14 }
   0x8   :  { %v22_v5 = vld [vmem:[#allocation2] sm:$0xff]  ;;  %v23_v9 = vld [vmem:[#allocation2 + $0x8] sm:$0xff] }
   0x9   :  { %141 = vmatmul.mubr.msk.bf16.vlgmr.msra.gmra.mrb[0].mxu0 %vm47_vm2, %v148_v3 }
  0xdc   :  { %v85_v7 = vpop.f32.mrb[0].mxu0 }
  0xdd   :  { %v92_v10 = vadd.f32 %v85_v7, %v22_v5  ;;  %v142_v11 = vpop.f32.mrb[1].mxu0 }
  0xde   :  { %v88_v12 = vpop.f32.mrb[2].mxu0 }
  0xdf   :  { %95 = vst.msk [vmem:[#allocation2] sm:$0xff] %vm19_vm0, %v92_v10  ;;  %v93_v15 = vadd.f32 %v88_v12, %v23_v9  ;;  %v143_v16 = vpop.f32.mrb[3].mxu0 }
  0xe1   :  { %96 = vst.msk [vmem:[#allocation2 + $0x8] sm:$0xff] %vm19_vm0, %v93_v15 }
  0xe6   :  { %v100_v18 = vld [vmem:[#allocation2] sm:$0xff] }
  0xe7   :  { %v108_v19 = vadd.f32 %v107_v17, %v100_v18 }
  0xe8   :  { %v101_v20 = vld [vmem:[#allocation2 + $0x8] sm:$0xff] }
  0xe9   :  { %v131_v21 = vpack.c.bf16 %v108_v19, %v108_v19  ;;  %v109_v22 = vadd.f32 %v107_v17, %v101_v20 }
  0xeb   :  { %119 = vst.msk [vmem:[%s196_s3] sm:$0xf] %vm118_vm3, %v131_v21  ;;  %v132_v23 = vpack.c.bf16 %v109_v22, %v109_v22 }
  0xed   :  { %120 = vst.msk [vmem:[%s196_s3 + $0x4] sm:$0xf] %vm118_vm3, %v132_v23 }

// kernel: _lambda_.81
= control target key start
LH: loop header
LB: loop body
LE: loop exit
PB: predicated region body
PF: predicated region fallthrough
CT: control target
= control target key end

     0   :  { %v165_v1 = vmov 0.0   ;;  %vm166_vm0 = vmmov 0   ;;  %vm17_vm1 = vcmask 523264   ;;  %s212_s0 = inlined_call_operand.vmem [shape: bf16[16,32], index: 0, kind: input, shape index: {}]   ;;  %s213_s1 = inlined_call_operand.vmem [shape: bf16[32,64], index: 1, kind: input, shape index: {}]   ;;  %s214_s2 = inlined_call_operand.hbm [shape: f32[16,64], index: 2, kind: output, shape index: {}]  }
   0x1   :  { %v138_v0 = vld [vmem:[%s213_s1] sm:$0xff]   ;;  %125 = vmatprep.subr.bf16.mxu0 %v165_v1  ;;  %v139_v2 = vld [vmem:[%s213_s1 + $0x8] sm:$0xff]   ;;  %129 = vmatprep.mubr.msk.bf16.mxu0 %vm166_vm0, %v165_v1 }
   0x2   :  { %126 = vmatpush3.bf16.msra.mxu0 %v138_v0 }
   0x3   :  { %127 = vmatprep.subr.bf16.mxu0 %v165_v1 }
   0x4   :  { %7 = vsyncpa [#allocation4], 0  ;;  %18 = vst.msk [vmem:[#allocation2] sm:$0xff] %vm17_vm1, %v165_v1  ;;  %v140_v3 = vld [vmem:[%s212_s0] sm:$0xff]   ;;  %vm45_vm2 = vcmask 261120   ;;  %s167_s1 = smov [#allocation3]  }
   0x5   :  { %19 = vst.msk [vmem:[#allocation2 + $0x8] sm:$0xff] %vm17_vm1, %v165_v1  ;;  %s107_s15 = sshll.u32 %s167_s1, 4  ;;  %s108_s15 = int_to_ptr.vmem [resolvable:$true] %s107_s15 }
   0x6   :  { %128 = vmatpush3.bf16.msra.mxu0 %v139_v2  ;;  %s141_s0 = scalar_lea.vmem %s108_s15, 256  ;;  %p146_p1 = scmp.lt.s32.totalorder %s108_s15, %s108_s15 }
   0x7   :  { %p142_p0 = scmp.ne.s32.totalorder %s108_s15, %s141_s0  ;;  %p147_p2 = scmp.lt.s32.totalorder %s141_s0, %s141_s0 }
   0x9   :  { %130 = vmatmul.mubr.msk.bf16.vlgmr.msra.gmra.mrb[0].mxu0 %vm45_vm2, %v140_v3  ;;  %p148_p3 = por %p147_p2, %p146_p1 }
   0xb   :  { %v20_v4 = vld [vmem:[#allocation2] sm:$0xff]  ;;  %p149_p4 = pnand %p148_p3, %p142_p0 }
   0xc   :  { %v21_v6 = vld [vmem:[#allocation2 + $0x8] sm:$0xff] }
  0xdc   :  { %v83_v5 = vpop.f32.mrb[0].mxu0 }
  0xdd   :  { %v90_v7 = vadd.f32 %v83_v5, %v20_v4  ;;  %v131_v8 = vpop.f32.mrb[1].mxu0 }
  0xde   :  { %v86_v9 = vpop.f32.mrb[2].mxu0 }
  0xdf   :  { %93 = vst.msk [vmem:[#allocation2] sm:$0xff] %vm17_vm1, %v90_v7  ;;  %v91_v10 = vadd.f32 %v86_v9, %v21_v6  ;;  %v132_v11 = vpop.f32.mrb[3].mxu0 }
  0xe1   :  { %94 = vst.msk [vmem:[#allocation2 + $0x8] sm:$0xff] %vm17_vm1, %v91_v10 }
  0xe6   :  { %v98_v12 = vld [vmem:[#allocation2] sm:$0xff] }
  0xe7   :  { %100 = vst.msk [vmem:[#allocation3] sm:$0xff] %vm17_vm1, %v98_v12 }
  0xe8   :  { %v99_v13 = vld [vmem:[#allocation2 + $0x8] sm:$0xff] }
  0xe9   :  { %101 = vst.msk [vmem:[#allocation3 + $0x8] sm:$0xff] %vm17_vm1, %v99_v13 }
  0xea   :  { %152 = shalt.err (!%p149_p4)
}
  0xeb   :  { %s153_s18 = scalar_lea.hbm %s214_s2, 256 }
  0xec   :  { %p154_p5 = scmp.ne.s32.totalorder %s214_s2, %s153_s18  ;;  %p157_p6 = scmp.lt.u32.totalorder %s153_s18, %s214_s2 }
  0xee   :  { %p159_p7 = pnand %p157_p6, %p154_p5 }
  0xf0   :  { %162 = shalt.err (!%p159_p7)
}
  0xf1   :  { %s168_s23 = smov 128   ;;  %s169_s24 = smov 8  }
  0xf2   :  { %113 = dma.vmem_to_hbm [thread:$0]  %s108_s15, 256, %s214_s2, [#allocation4], %s168_s23, %s168_s23, %s169_s24  }
  0xf3   :  { %163 = dma.done.wait [#allocation4], 256  }
  0xf4   :  { %164 = vsyncadd [#allocation4], 4294967040 }
  0xf5   :  { %117 = vsyncpa [#allocation4], 1 }

// kernel: _lambda_.58
= control target key start
LH: loop header
LB: loop body
LE: loop exit
PB: predicated region body
PF: predicated region fallthrough
CT: control target
= control target key end

     0   :  { %s982_s15 = smov 0   ;;  %s1087_s0 = inlined_call_operand.vmem [shape: bf16[2,8,32], index: 0, kind: input, shape index: {}]   ;;  %s1088_s1 = inlined_call_operand.vmem [shape: bf16[2,8,32], index: 1, kind: input, shape index: {}]   ;;  %s1089_s2 = inlined_call_operand.vmem [shape: bf16[2,8,32], index: 2, kind: input, shape index: {}]   ;;  %s1090_s3 = inlined_call_operand.vmem [shape: f32[2,1,8], index: 3, kind: input, shape index: {}]   ;;  %s1091_s4 = inlined_call_operand.vmem [shape: bf16[2,8,32], index: 4, kind: output, shape index: {}]  }
   0x1 LB: > { %s820_s16 = sadd.s32 4294967295, %s947_s15   ;;  %p824_p0 = scmp.ge.s32.totalorder %s947_s15, 1  ;;  %s947_s15 = sphi %s982_s15, %s14_s15  }
   0x2   : > { %p187_p1 = scmp.lt.s32.totalorder %s947_s15, 3 }
   0x4   : > { %p188_p2 = pnand %p824_p0, %p187_p1 }
   0x5   : > { %p222_p3 = scmp.lt.s32.totalorder (!%p188_p2), %s820_s16, 1  ;;  %v949_v0 = vmov (!%p188_p2), 0.0   ;;  %vm950_vm0 = vmmov (!%p188_p2), 0   ;;  %vm261_vm1 = vcmask (!%p188_p2), 64512   ;;  %v248_v4 = vlaneseq (!%p188_p2)  ;;  %s951_s27 = smov (!%p188_p2), 120  }
   0x6   : > { %191 = sbr.rel (%p188_p2) target bundleno = 1481 (0x5c9), region = 36  ;;  %858 = vmatprep.subr.bf16.mxu0 (!%p188_p2), %v949_v0  ;;  %860 = vmatprep.mubr.msk.bf16.mxu0 (!%p188_p2), %vm950_vm0, %v949_v0  ;;  %s952_s28 = smov (!%p188_p2), 112   ;;  %vm325_vm3 = vcmask (!%p188_p2), 1043456   ;;  %vm727_vm4 = vcmask (!%p188_p2), 130048   ;;  %vm729_vm5 = vcmask (!%p188_p2), 195584   ;;  %vm732_vm6 = vcmask (!%p188_p2), 257024  }
   0x7   : > { %864 = vmatprep.subr.bf16.mxu1 (!%p188_p2), %v949_v0  ;;  %866 = vmatprep.mubr.msk.bf16.mxu1 (!%p188_p2), %vm950_vm0, %v949_v0  ;;  %v249_v7 = vshrl.u32 (!%p188_p2), %v248_v4, 7  ;;  %v251_v8 = vand.u32 (!%p188_p2), 127, %v248_v4  ;;  %s953_s29 = smov (!%p188_p2), 104   ;;  %s954_s7 = smov (!%p188_p2), 8  }
   0x8   : > { %s955_s8 = smov (!%p188_p2), 16   ;;  %s956_s9 = smov (!%p188_p2), 24  }
   0x9   : > { %v257_v10 = vsub.s32 (!%p188_p2), 0, %v249_v7  ;;  %vm252_vm2 = vcmp.gt.s32.totalorder (!%p188_p2), %v251_v8, %v249_v7 }
   0xa   : > { %v253_v12 = vsel (!%p188_p2), %vm252_vm2, -1e+09, %v949_v0 }
   0xd   : > { %s1093_s16 = smov (!%p222_p3, %s820_s16), 1 }
   0xe   : > { %s996_s17 = sshll.u32 %s1093_s16, 2  ;;  %s236_s26 = scalar_lea.vmem %s1090_s3, %s1093_s16 }
   0xf   : > { %s229_s20 = scalar_lea.vmem %s1088_s1, %s996_s17  ;;  %s225_s23 = scalar_lea.vmem %s1087_s0, %s996_s17  ;;  %v245_v5 = vld [vmem:[%s236_s26] sm:$0x1] }
  0x10   : > { %v243_v1 = vld [vmem:[%s229_s20] sm:$0xf]  ;;  %v246_v6 = vsub.f32 1.0, %v245_v5  ;;  %s233_s6 = scalar_lea.vmem %s1089_s2, %s996_s17  ;;  %s240_s12 = scalar_lea.vmem %s1091_s4, %s996_s17 }
  0x11   : > { %v266_v2 = vsel %vm261_vm1, %v243_v1, 0  ;;  %v242_v3 = vld [vmem:[%s225_s23] sm:$0xf]  ;;  %v832_v21 = vcombine.low %v243_v1, %v243_v1 }
  0x12   : > { %859 = vmatpush3.bf16.xpose.msra.mxu0 %v266_v2  ;;  %v247_v9 = vmul.f32 -1e+09, %v246_v6  ;;  %v831_v22 = vcombine.low %v242_v3, %v242_v3  ;;  %v1029_v28 = vld [vmem:[%s233_s6] sm:$0xf] }
  0x13   : > { %876 = vmatprep.subr.bf16.mxu0 %v949_v0  ;;  %377 = vrot.lane.b32.xlu1 %v832_v21, %s951_s27  ;;  %v327_v29 = vsel %vm325_vm3, %v1029_v28, 0 }
  0x14   : > { %v258_v11 = vrot.slane %v247_v9, %v257_v10  ;;  %865 = vmatpush3.bf16.msra.mxu1 %v327_v29 }
  0x15   : > { %870 = vmatprep.subr.bf16.mxu1 %v949_v0 }
  0x16   : > { %v1015_v13 = vadd.f32 %v258_v11, %v253_v12 }
  0x17   : > { %372 = vrot.lane.b32.xlu1 %v831_v22, %s951_s27 }
  0x19   : > { %861 = vmatmul.mubr.msk.bf16.vlgmr.msra.gmra.mrb[0].mxu0 %vm261_vm1, %v242_v3 }
  0x1a   : > { %878 = vmatprep.mubr.msk.bf16.mxu0 %vm950_vm0, %v949_v0 }
  0x1b   : > { %490 = vrot.lane.b32.xlu1 %v831_v22, %s952_s28 }
  0x1f   : > { %604 = vrot.lane.b32.xlu1 %v832_v21, %s953_s29 }
  0x23   : > { %602 = vrot.lane.b32.xlu1 %v831_v22, %s953_s29 }
  0x85   : > { %v378_v32 = vpop.permute.xlu1 %377 }
  0x86   : > { %v383_v34 = vsel %vm261_vm1, %v378_v32, 0 }
  0x89   : > { %v373_v36 = vpop.permute.xlu1 %372 }
  0x8d   : > { %v491_v38 = vpop.permute.xlu1 %490 }
  0x91   : > { %v605_v40 = vpop.permute.xlu1 %604 }
  0x92   : > { %v610_v41 = vsel %vm261_vm1, %v605_v40, 0 }
  0x95   : > { %v603_v42 = vpop.permute.xlu1 %602 }
  0xec   : > { %v302_v14 = vpop.f32.mrb[0].mxu0 }
  0xed   : > { %v308_v15 = vmul.f32 0.35355338, %v302_v14  ;;  %v862_v16 = vpop.f32.mrb[1].mxu0 }
  0xee   : > { %v305_v17 = vpop.f32.mrb[2].mxu0 }
  0xef   : > { %v863_v18 = vpop.f32.mrb[3].mxu0  ;;  %v309_v19 = vadd.f32 %v308_v15, %v1015_v13 }
  0xf1   : > { %v310_v20 = vsel %vm261_vm1, %v309_v19, -inf }
  0xf2   : > { %311 = vmax.xlane.f32.xlu0 %v310_v20 }
 0x17f   : > { %v312_v23 = vpop.xlane.xlu0 %311 }
 0x180   : > { %v313_v24 = vsub.f32 %v309_v19, %v312_v23 }
 0x182   : > { %v314_v25 = vmul.f32 1.442695, %v313_v24 }
 0x184   : > { %925 = vpow2.f32 %v314_v25 }
 0x18e   : > { %v926_v26 = vpop.eup %925 }
 0x18f   : > { %v316_v27 = vsel %vm261_vm1, %v926_v26, 0.0 }
 0x190   : > { %317 = vadd.xlane.f32.xlu0 %v316_v27 }
 0x1a6   : > { %492 = vrot.lane.b32.xlu0 %v832_v21, %s952_s28 }
 0x21d   : > { %v318_v30 = vpop.xlane.xlu0 %317 }
 0x21e   : > { %927 = vrcp.f32 %v318_v30 }
 0x221   : > { %v493_v37 = vpop.permute.xlu0 %492 }
 0x222   : > { %v498_v39 = vsel %vm261_vm1, %v493_v37, 0 }
 0x228   : > { %v928_v31 = vpop.eup %927 }
 0x229   : > { %v320_v33 = vmul.f32 %v928_v31, %v926_v26 }
 0x22b   : > { %v321_v35 = vpack.c.bf16 %v320_v33, %v320_v33 }
 0x22d   : > { %867 = vmatmul.mubr.msk.bf16.vlgmr.msra.gmra.mrb[0].mxu1 %vm261_vm1, %v321_v35 }
 0x22e   : > { %871 = vmatpush3.bf16.xpose.msra.mxu1 %v383_v34  ;;  %872 = vmatprep.mubr.msk.bf16.mxu1 %vm950_vm0, %v949_v0 }
 0x22f   : > { %882 = vmatprep.subr.bf16.mxu1 %v949_v0 }
 0x235   : > { %873 = vmatmul.mubr.msk.bf16.vlgmr.msra.gmra.mrb[4].mxu1 %vm261_vm1, %v373_v36 }
 0x236   : > { %883 = vmatpush3.bf16.xpose.msra.mxu1 %v498_v39  ;;  %884 = vmatprep.mubr.msk.bf16.mxu1 %vm950_vm0, %v949_v0 }
 0x237   : > { %894 = vmatprep.subr.bf16.mxu1 %v949_v0 }
 0x23d   : > { %885 = vmatmul.mubr.msk.bf16.vlgmr.msra.gmra.mrb[8].mxu1 %vm261_vm1, %v491_v38 }
 0x23e   : > { %895 = vmatpush3.bf16.xpose.msra.mxu1 %v610_v41  ;;  %896 = vmatprep.mubr.msk.bf16.mxu1 %vm950_vm0, %v949_v0 }
 0x245   : > { %897 = vmatmul.mubr.msk.bf16.vlgmr.msra.gmra.mrb[12].mxu1 %vm261_vm1, %v603_v42 }
 0x300   : > { %v1050_v43 = vpop.f32.mrb[0].mxu1 }
 0x301   : > { %v868_v44 = vpop.f32.mrb[1].mxu1 }
 0x302   : > { %v366_v45 = vpop.f32.mrb[2].mxu1 }
 0x303   : > { %v869_v46 = vpop.f32.mrb[3].mxu1 }
 0x308   : > { %v419_v47 = vpop.f32.mrb[4].mxu1 }
 0x309   : > { %v425_v48 = vmul.f32 0.35355338, %v419_v47  ;;  %v874_v49 = vpop.f32.mrb[5].mxu1 }
 0x30a   : > { %v422_v50 = vpop.f32.mrb[6].mxu1 }
 0x30b   : > { %v875_v51 = vpop.f32.mrb[7].mxu1  ;;  %v426_v52 = vadd.f32 %v425_v48, %v1015_v13 }
 0x30d   : > { %v427_v53 = vsel %vm261_vm1, %v426_v52, -inf }
 0x30e   : > { %428 = vmax.xlane.f32.xlu1 %v427_v53 }
 0x310   : > { %v534_v54 = vpop.f32.mrb[8].mxu1 }
 0x311   : > { %v540_v55 = vmul.f32 0.35355338, %v534_v54  ;;  %v886_v56 = vpop.f32.mrb[9].mxu1 }
 0x312   : > { %v537_v57 = vpop.f32.mrb[10].mxu1 }
 0x313   : > { %v541_v58 = vadd.f32 %v540_v55, %v1015_v13  ;;  %v887_v59 = vpop.f32.mrb[11].mxu1 }
 0x315   : > { %v542_v60 = vsel %vm261_vm1, %v541_v58, -inf }
 0x316   : > { %543 = vmax.xlane.f32.xlu0 %v542_v60 }
 0x318   : > { %v646_v61 = vpop.f32.mrb[12].mxu1 }
 0x319   : > { %v652_v62 = vmul.f32 0.35355338, %v646_v61  ;;  %v898_v63 = vpop.f32.mrb[13].mxu1 }
 0x31a   : > { %v649_v1 = vpop.f32.mrb[14].mxu1 }
 0x31b   : > { %v653_v2 = vadd.f32 %v652_v62, %v1015_v13  ;;  %v899_v3 = vpop.f32.mrb[15].mxu1  ;;  %v834_v13 = vcombine.low %v1029_v28, %v1029_v28 }
 0x31d   : > { %v654_v4 = vsel %vm261_vm1, %v653_v2, -inf }
 0x31e   : > { %655 = vmax.xlane.f32.xlu1 %v654_v4 }
 0x39b   : > { %v429_v5 = vpop.xlane.xlu1 %428 }
 0x39c   : > { %v430_v6 = vsub.f32 %v426_v52, %v429_v5 }
 0x39e   : > { %v431_v7 = vmul.f32 1.442695, %v430_v6 }
 0x3a0   : > { %929 = vpow2.f32 %v431_v7 }
 0x3a3   : > { %v544_v8 = vpop.xlane.xlu0 %543 }
 0x3a4   : > { %v545_v9 = vsub.f32 %v541_v58, %v544_v8 }
 0x3a6   : > { %v546_v10 = vmul.f32 1.442695, %v545_v9 }
 0x3a8   : > { %931 = vpow2.f32 %v546_v10 }
 0x3aa   : > { %v930_v11 = vpop.eup %929 }
 0x3ab   : > { %v433_v12 = vsel %vm261_vm1, %v930_v11, 0.0  ;;  %v656_v16 = vpop.xlane.xlu1 %655 }
 0x3ac   : > { %434 = vadd.xlane.f32.xlu1 %v433_v12  ;;  %v657_v17 = vsub.f32 %v653_v2, %v656_v16 }
 0x3ae   : > { %v658_v18 = vmul.f32 1.442695, %v657_v17 }
 0x3b0   : > { %933 = vpow2.f32 %v658_v18 }
 0x3b2   : > { %v932_v14 = vpop.eup %931 }
 0x3b3   : > { %v548_v15 = vsel %vm261_vm1, %v932_v14, 0.0 }
 0x3b4   : > { %549 = vadd.xlane.f32.xlu0 %v548_v15 }
 0x3ba   : > { %v934_v19 = vpop.eup %933 }
 0x3bb   : > { %v660_v20 = vsel %vm261_vm1, %v934_v19, 0.0 }
 0x3bd   : > { %554 = vrot.lane.b32.xlu1 %v834_v13, %s952_s28 }
 0x3ca   : > { %442 = vrot.lane.b32.xlu0 %v834_v13, %s951_s27 }
 0x3e1   : > { %661 = vadd.xlane.f32.xlu1 %v660_v20 }
 0x3f2   : > { %666 = vrot.lane.b32.xlu1 %v834_v13, %s953_s29 }
 0x439   : > { %v435_v21 = vpop.xlane.xlu1 %434 }
 0x43a   : > { %935 = vrcp.f32 %v435_v21 }
 0x43d   : > { %v555_v27 = vpop.permute.xlu1 %554 }
 0x43e   : > { %v560_v29 = vsel %vm325_vm3, %v555_v27, 0 }
 0x441   : > { %v550_v22 = vpop.xlane.xlu0 %549 }
 0x442   : > { %937 = vrcp.f32 %v550_v22 }
 0x444   : > { %v936_v23 = vpop.eup %935 }
 0x445   : > { %v437_v24 = vmul.f32 %v936_v23, %v930_v11  ;;  %v443_v25 = vpop.permute.xlu0 %442 }
 0x446   : > { %v448_v26 = vsel %vm325_vm3, %v443_v25, 0 }
 0x447   : > { %877 = vmatpush3.bf16.msra.mxu0 %v448_v26  ;;  %v438_v28 = vpack.c.bf16 %v437_v24, %v437_v24 }
 0x448   : > { %888 = vmatprep.subr.bf16.mxu0 %v949_v0 }
 0x44a   : > { %879 = vmatmul.mubr.msk.bf16.vlgmr.msra.gmra.mrb[4].mxu0 %vm261_vm1, %v438_v28 }
 0x44b   : > { %889 = vmatpush3.bf16.msra.mxu0 %v560_v29  ;;  %890 = vmatprep.mubr.msk.bf16.mxu0 %vm950_vm0, %v949_v0 }
 0x44c   : > { %v938_v30 = vpop.eup %937  ;;  %900 = vmatprep.subr.bf16.mxu0 %v949_v0 }
 0x44d   : > { %v552_v31 = vmul.f32 %v938_v30, %v932_v14 }
 0x44f   : > { %v553_v32 = vpack.c.bf16 %v552_v31, %v552_v31 }
 0x452   : > { %891 = vmatmul.mubr.msk.bf16.vlgmr.msra.gmra.mrb[8].mxu0 %vm261_vm1, %v553_v32 }
 0x453   : > { %902 = vmatprep.mubr.msk.bf16.mxu0 %vm950_vm0, %v949_v0 }
 0x46e   : > { %v662_v33 = vpop.xlane.xlu1 %661 }
 0x46f   : > { %939 = vrcp.f32 %v662_v33 }
 0x472   : > { %v667_v34 = vpop.permute.xlu1 %666 }
 0x473   : > { %v672_v35 = vsel %vm325_vm3, %v667_v34, 0 }
 0x474   : > { %901 = vmatpush3.bf16.msra.mxu0 %v672_v35 }
 0x479   : > { %v940_v36 = vpop.eup %939 }
 0x47a   : > { %v664_v37 = vmul.f32 %v940_v36, %v934_v19 }
 0x47c   : > { %v665_v38 = vpack.c.bf16 %v664_v37, %v664_v37 }
 0x47e   : > { %903 = vmatmul.mubr.msk.bf16.vlgmr.msra.gmra.mrb[12].mxu0 %vm261_vm1, %v665_v38 }
 0x51d   : > { %v484_v39 = vpop.f32.mrb[4].mxu0 }
 0x51e   : > { %715 = vrot.lane.b32.xlu0 %v484_v39, %s954_s7  ;;  %v880_v40 = vpop.f32.mrb[5].mxu0 }
 0x51f   : > { %v487_v41 = vpop.f32.mrb[6].mxu0 }
 0x520   : > { %v881_v42 = vpop.f32.mrb[7].mxu0 }
 0x525   : > { %v596_v44 = vpop.f32.mrb[8].mxu0 }
 0x526   : > { %719 = vrot.lane.b32.xlu1 %v596_v44, %s955_s8  ;;  %v892_v0 = vpop.f32.mrb[9].mxu0 }
 0x527   : > { %v599_v45 = vpop.f32.mrb[10].mxu0 }
 0x528   : > { %v893_v46 = vpop.f32.mrb[11].mxu0 }
 0x551   : > { %v708_v47 = vpop.f32.mrb[12].mxu0 }
 0x552   : > { %723 = vrot.lane.b32.xlu0 %v708_v47, %s956_s9  ;;  %v904_v48 = vpop.f32.mrb[13].mxu0 }
 0x553   : > { %v711_v49 = vpop.f32.mrb[14].mxu0 }
 0x554   : > { %v905_v50 = vpop.f32.mrb[15].mxu0 }
 0x590   : > { %v716_v51 = vpop.permute.xlu0 %715 }
 0x591   : > { %v726_v53 = vsel %vm261_vm1, %v1050_v43, %v716_v51 }
 0x598   : > { %v720_v52 = vpop.permute.xlu1 %719 }
 0x599   : > { %v728_v54 = vsel %vm727_vm4, %v726_v53, %v720_v52 }
 0x5c4   : > { %v724_v55 = vpop.permute.xlu0 %723 }
 0x5c5   : > { %v730_v56 = vsel %vm729_vm5, %v728_v54, %v724_v55 }
 0x5c6   : > { %v731_v57 = vpack.c.bf16 %v730_v56, %v730_v56 }
 0x5c8   : > { %733 = vst.msk [vmem:[%s240_s12] sm:$0xf] %vm732_vm6, %v731_v57 }
 0x5c9 PF: > { %s14_s15 = sadd.s32 1, %s947_s15  }
 0x5ca   : > { %p11_p4 = scmp.ge.s32.totalorder %s14_s15, 4  }
 0x5cc   :  { %13 = sbr.rel (!%p11_p4) target bundleno = 1 (0x1), region = 75 }

</bundles_post_ra>
